<compile_context>
chip_gen: v7x
topology: tpu7x:2x2x1
jax: 0.10.0
libtpu: 0.0.40
codegen_flags: <defaults>
</compile_context>

<pallas_src>
import functools
import math

import jax
import jax.numpy as jnp
from jax.experimental import pallas as pl
from jax.experimental.pallas import tpu as pltpu

BN_EPS = 1e-5


def _silu(y):
    # y is f32; the reciprocal goes to the EUP slot.
    return y * pl.reciprocal(1.0 + jnp.exp(-y), approx=True)


# --------------------------------------------------------------------------------------
# Kernel 1: one pass over x -> two column-block outputs  (x@wa, x@wb), fused bias/act.
# Used for cv1 (two C2f chunks) and for the fused value_proj + offset_mask projection.
# --------------------------------------------------------------------------------------
def _mm2out_kernel(x_ref, wa_ref, wb_ref, ba_ref, bb_ref, oa_ref, ob_ref, *, act):
    x = x_ref[...]
    ya = jnp.dot(x, wa_ref[...], preferred_element_type=jnp.float32) + ba_ref[...]
    yb = jnp.dot(x, wb_ref[...], preferred_element_type=jnp.float32) + bb_ref[...]
    if act:
        ya = _silu(ya)
        yb = _silu(yb)
    oa_ref[...] = ya.astype(oa_ref.dtype)
    ob_ref[...] = yb.astype(ob_ref.dtype)


def matmul_2out(x, wa, wb, ba, bb, *, act, dta, dtb, tm=512):
    """x: (M, K) bf16; wa/wb: (K, Na/Nb) bf16; ba/bb: f32 -> ((M, Na) dta, (M, Nb) dtb)."""
    M, K = x.shape
    Na, Nb = wa.shape[1], wb.shape[1]
    ba = ba.reshape(1, Na).astype(jnp.float32)
    bb = bb.reshape(1, Nb).astype(jnp.float32)
    Mp = int(pl.cdiv(M, tm)) * tm
    if Mp != M:
        x = jnp.pad(x, ((0, Mp - M), (0, 0)))
    oa, ob = pl.pallas_call(
        functools.partial(_mm2out_kernel, act=act),
        out_shape=(jax.ShapeDtypeStruct((Mp, Na), dta),
                   jax.ShapeDtypeStruct((Mp, Nb), dtb)),
        grid=(Mp // tm,),
        in_specs=[
            pl.BlockSpec((tm, K), lambda i: (i, 0)),
            pl.BlockSpec((K, Na), lambda i: (0, 0)),
            pl.BlockSpec((K, Nb), lambda i: (0, 0)),
            pl.BlockSpec((1, Na), lambda i: (0, 0)),
            pl.BlockSpec((1, Nb), lambda i: (0, 0)),
        ],
        out_specs=(pl.BlockSpec((tm, Na), lambda i: (i, 0)),
                   pl.BlockSpec((tm, Nb), lambda i: (i, 0))),
        compiler_params=pltpu.CompilerParams(dimension_semantics=("parallel",)),
    )(x, wa, wb, ba, bb)
    if Mp != M:
        oa, ob = oa[:M], ob[:M]
    return oa, ob


# --------------------------------------------------------------------------------------
# Kernel 2: cv2 over the implicit concat [a | b | c]  -> silu(a@wa + b@wb + c@wc + bias)
# (avoids materializing jnp.concatenate of the activations)
# --------------------------------------------------------------------------------------
def _mm3cat_kernel(a_ref, b_ref, c_ref, wa_ref, wb_ref, wc_ref, bias_ref, o_ref, *, act):
    y = jnp.dot(a_ref[...], wa_ref[...], preferred_element_type=jnp.float32)
    y = y + jnp.dot(b_ref[...], wb_ref[...], preferred_element_type=jnp.float32)
    y = y + jnp.dot(c_ref[...], wc_ref[...], preferred_element_type=jnp.float32)
    y = y + bias_ref[...]
    if act:
        y = _silu(y)
    o_ref[...] = y.astype(o_ref.dtype)


def matmul_cat3(a, b, c, wa, wb, wc, bias, *, act, out_dtype, tm=512):
    M = a.shape[0]
    N = wa.shape[1]
    bias = bias.reshape(1, N).astype(jnp.float32)
    Mp = int(pl.cdiv(M, tm)) * tm
    if Mp != M:
        a = jnp.pad(a, ((0, Mp - M), (0, 0)))
        b = jnp.pad(b, ((0, Mp - M), (0, 0)))
        c = jnp.pad(c, ((0, Mp - M), (0, 0)))
    Ka, Kb, Kc = a.shape[1], b.shape[1], c.shape[1]
    out = pl.pallas_call(
        functools.partial(_mm3cat_kernel, act=act),
        out_shape=jax.ShapeDtypeStruct((Mp, N), out_dtype),
        grid=(Mp // tm,),
        in_specs=[
            pl.BlockSpec((tm, Ka), lambda i: (i, 0)),
            pl.BlockSpec((tm, Kb), lambda i: (i, 0)),
            pl.BlockSpec((tm, Kc), lambda i: (i, 0)),
            pl.BlockSpec((Ka, N), lambda i: (0, 0)),
            pl.BlockSpec((Kb, N), lambda i: (0, 0)),
            pl.BlockSpec((Kc, N), lambda i: (0, 0)),
            pl.BlockSpec((1, N), lambda i: (0, 0)),
        ],
        out_specs=pl.BlockSpec((tm, N), lambda i: (i, 0)),
        compiler_params=pltpu.CompilerParams(dimension_semantics=("parallel",)),
    )(a, b, c, wa, wb, wc, bias)
    return out[:M] if Mp != M else out


# --------------------------------------------------------------------------------------
# Kernel 3: 3x3 conv (stride 1, pad 1) + BN + SiLU, row-band tiled with one-row halos.
# im2col is built in VMEM per band (9 shifted slices of the halo-extended band + one matmul).
# --------------------------------------------------------------------------------------
def _conv3x3_kernel(top_ref, x_ref, bot_ref, w_ref, b_ref, o_ref, *, W, R, act):
    r = pl.program_id(1)
    band = x_ref[0]                                      # (R*W, cin) bf16
    cin = band.shape[-1]
    # zero the halos at the image's top/bottom edge (scalar mask, cheap)
    tmask = jnp.where(r == 0, 0.0, 1.0).astype(band.dtype)
    bmask = jnp.where(r == pl.num_programs(1) - 1, 0.0, 1.0).astype(band.dtype)
    top = top_ref[0] * tmask                             # (W, cin)
    bot = bot_ref[0] * bmask                             # (W, cin)
    zrow = jnp.zeros((1, cin), band.dtype)
    xe = jnp.concatenate([zrow, top, band, bot, zrow], axis=0)   # ((R+2)*W + 2, cin)
    Lb = R * W
    wcol = jax.lax.broadcasted_iota(jnp.int32, (Lb, 1), 0) % W
    taps = []
    for kh in range(3):
        for kw in range(3):
            s = kh * W + kw                              # slice offset into the padded band
            xs = xe[s:s + Lb]
            # horizontal wrap mask (vertical handled by the halos / edge zeroing)
            if kw == 0:
                xs = jnp.where(wcol > 0, xs, jnp.zeros_like(xs))
            elif kw == 2:
                xs = jnp.where(wcol < W - 1, xs, jnp.zeros_like(xs))
            taps.append(xs)
    xcol = jnp.concatenate(taps, axis=-1)                # (Lb, 9*cin) bf16 (VMEM im2col)
    y = jnp.dot(xcol, w_ref[...], preferred_element_type=jnp.float32) + b_ref[...]
    if act:
        y = _silu(y)
    o_ref[0] = y.astype(o_ref.dtype)


def _pick_band_rows(H, W, cin, budget_bytes=4 << 20):
    """Largest divisor of H whose (R*W, 9*cin) bf16 im2col slab fits the budget."""
    best = 1
    for r in range(1, H + 1):
        if H % r == 0 and r * W * 9 * cin * 2 <= budget_bytes:
            best = r
    return best


def conv3x3_bn_silu(x_nlc, wm, bias, H, W, *, band_rows=None, out_dtype=jnp.bfloat16):
    """x_nlc: (N, L, cin) bf16; wm: (9*cin, cout) bf16 (BN folded); bias: (cout,) f32."""
    N, L, cin = x_nlc.shape
    cout = wm.shape[1]
    bias2 = bias.reshape(1, cout).astype(jnp.float32)
    if W % 8 == 0:
        R = band_rows if band_rows is not None else _pick_band_rows(H, W, cin)
        assert H % R == 0
        halo = x_nlc
        top_map = lambda n, r: (n, jnp.maximum(r * R - 1, 0), 0)      # block units of W rows
        bot_map = lambda n, r: (n, jnp.minimum((r + 1) * R, H - 1), 0)
    else:
        # TODO(synk): W not a multiple of 8 cannot use W-row halo blocks under the (8,128)
        # block-shape rule; fall back to whole-image bands with explicit zero halos.
        R = H
        halo = jnp.zeros((N, W, cin), x_nlc.dtype)
        top_map = lambda n, r: (n, 0, 0)
        bot_map = lambda n, r: (n, 0, 0)
    return pl.pallas_call(
        functools.partial(_conv3x3_kernel, W=W, R=R, act=True),
        out_shape=jax.ShapeDtypeStruct((N, L, cout), out_dtype),
        grid=(N, H // R),
        in_specs=[
            pl.BlockSpec((1, W, cin), top_map),
            pl.BlockSpec((1, R * W, cin), lambda n, r: (n, r, 0)),
            pl.BlockSpec((1, W, cin), bot_map),
            pl.BlockSpec((9 * cin, cout), lambda n, r: (0, 0)),
            pl.BlockSpec((1, cout), lambda n, r: (0, 0)),
        ],
        out_specs=pl.BlockSpec((1, R * W, cout), lambda n, r: (n, r, 0)),
        compiler_params=pltpu.CompilerParams(dimension_semantics=("parallel", "parallel")),
    )(halo, x_nlc, halo, wm, bias2)


# --------------------------------------------------------------------------------------
# Kernel 4: DCNv4 deformable sampling, tiled (L_out x L_in), all groups per invocation,
# input-tile skipping + prefetch-clamped value DMA, output_proj fused into the epilogue.
# --------------------------------------------------------------------------------------
def _dcn_kernel(jmin_ref, jmax_ref, val_ref, om_ref, opw_ref, opb_ref, o_ref, acc_ref, *,
                H, W, G, K, ksize, pad, dil, offset_scale, tl_out, tl_in, n_out_tiles):
    n = pl.program_id(0)
    i = pl.program_id(1)
    j = pl.program_id(2)

    @pl.when(j == 0)
    def _():
        acc_ref[...] = jnp.zeros_like(acc_ref)

    t = n * n_out_tiles + i
    lo = jmin_ref[t]
    hi = jmax_ref[t]

    # Skip input tiles that provably contain no sampled location (their A is all-zero):
    # removes most of the O(L_out x L_in) compare/select work.
    @pl.when((j >= lo) & (j <= hi))
    def _():
        om = om_ref[0]                                   # (tl_out, >=3*G*K) f32
        val = val_ref[0]                                 # (tl_in, C)        bf16
        C = val.shape[-1]
        gc = C // G

        # base conv tap positions; tap//ksize <-> x, tap%ksize <-> y matches DCNv3/v4's
        # meshgrid(indexing='ij') (kw-major) tap flattening (corner- vs center-anchoring is
        # identical for pad = dil*(ksize-1)//2).
        row = jax.lax.broadcasted_iota(jnp.int32, (tl_out, K), 0) + i * tl_out
        tap = jax.lax.broadcasted_iota(jnp.int32, (tl_out, K), 1)
        base_x = ((row % W) - pad + (tap // ksize) * dil).astype(jnp.float32)
        base_y = ((row // W) - pad + (tap % ksize) * dil).astype(jnp.float32)

        # global input-location index of each column of the (tl_out, tl_in) sampling slab
        col = jax.lax.broadcasted_iota(jnp.int32, (tl_out, tl_in), 1) + j * tl_in

        for g in range(G):                               # static unroll over groups
            o0 = g * 3 * K
            off_x = om[:, o0:o0 + K]
            off_y = om[:, o0 + K:o0 + 2 * K]
            msk = om[:, o0 + 2 * K:o0 + 3 * K]           # DCNv4: modulation WITHOUT softmax
            sx = base_x + off_x * offset_scale
            sy = base_y + off_y * offset_scale
            x0 = jnp.floor(sx)
            y0 = jnp.floor(sy)
            fx = sx - x0
            fy = sy - y0
            x0i = x0.astype(jnp.int32)
            y0i = y0.astype(jnp.int32)

            # bf16 select/accumulate (A feeds the MXU in bf16 anyway); compares stay int32.
            A = jnp.zeros((tl_out, tl_in), jnp.bfloat16)
            for k in range(K):                           # static unroll over kernel taps
                fxk = fx[:, k:k + 1]
                fyk = fy[:, k:k + 1]
                mk = msk[:, k:k + 1]
                corners = (
                    (0, 0, (1.0 - fyk) * (1.0 - fxk)),
                    (0, 1, (1.0 - fyk) * fxk),
                    (1, 0, fyk * (1.0 - fxk)),
                    (1, 1, fyk * fxk),
                )
                for dy, dx, wgt in corners:
                    xi = x0i[:, k:k + 1] + dx
                    yi = y0i[:, k:k + 1] + dy
                    valid = (xi >= 0) & (xi < W) & (yi >= 0) & (yi < H)
                    idx = jnp.where(valid, yi * W + xi, -1)
                    contrib = (wgt * mk).astype(jnp.bfloat16)
                    A = A + jnp.where(idx == col, contrib, jnp.zeros_like(A))
            # per-group accumulation; lane-dense assembly is deferred to the epilogue
            acc_ref[g] += jnp.dot(A, val[:, g * gc:(g + 1) * gc],
                                  preferred_element_type=jnp.float32)

    @pl.when(j == pl.num_programs(2) - 1)
    def _():
        C = o_ref.shape[-1]
        gc = C // G
        opw = opw_ref[...]                               # (C, C) bf16
        y = jnp.dot(acc_ref[0].astype(jnp.bfloat16), opw[0:gc, :],
                    preferred_element_type=jnp.float32)
        for g in range(1, G):
            y = y + jnp.dot(acc_ref[g].astype(jnp.bfloat16), opw[g * gc:(g + 1) * gc, :],
                            preferred_element_type=jnp.float32)
        y = y + opb_ref[...]
        o_ref[0] = y.astype(o_ref.dtype)


def _touched_tile_range(om, H, W, G, K, ksize, pad, dil, offset_scale, tl_out, tl_in):
    """Per (image, output tile) conservative [jmin, jmax] of input tiles touched by sampling.

    Mirrors the kernel's candidate-index arithmetic; corner indices are clipped into the
    image, so the range is a superset of every VALID sample location -> skipping tiles
    outside [jmin, jmax] is exact."""
    N, Lp, _ = om.shape
    nom = 3 * G * K
    row = jnp.arange(Lp, dtype=jnp.int32)[:, None]
    tap = jnp.arange(K, dtype=jnp.int32)[None, :]
    base_x = ((row % W) - pad + (tap // ksize) * dil).astype(jnp.float32)   # (Lp, K)
    base_y = ((row // W) - pad + (tap % ksize) * dil).astype(jnp.float32)
    omr = om[..., :nom].reshape(N, Lp, G, 3, K)
    sx = base_x[None, :, None, :] + omr[:, :, :, 0, :] * offset_scale
    sy = base_y[None, :, None, :] + omr[:, :, :, 1, :] * offset_scale
    x0 = jnp.floor(sx).astype(jnp.int32)
    y0 = jnp.floor(sy).astype(jnp.int32)
    lo = jnp.clip(y0, 0, H - 1) * W + jnp.clip(x0, 0, W - 1)
    hi = jnp.clip(y0 + 1, 0, H - 1) * W + jnp.clip(x0 + 1, 0, W - 1)
    lo = lo.min(axis=(2, 3)).reshape(N, Lp // tl_out, tl_out).min(axis=2)
    hi = hi.max(axis=(2, 3)).reshape(N, Lp // tl_out, tl_out).max(axis=2)
    jmin = (lo // tl_in).astype(jnp.int32).reshape(-1)
    jmax = (hi // tl_in).astype(jnp.int32).reshape(-1)
    return jmin, jmax


def dcnv4(x_nlc, p, H, W, *, group=4, ksize=3, pad=1, dil=1, offset_scale=1.0,
          tl_out=256, tl_in=128, full_range=False, out_dtype=jnp.bfloat16):
    """x_nlc: (N, L, C) bf16.  p: canonical DCNv4 params (PyTorch layouts).
    tl_out=256/tl_in=128 fills the 256-wide MXU on v6e/v7x; use 128/128 on v5e."""
    N, L, C = x_nlc.shape
    K = ksize * ksize
    nom = group * 3 * K
    om_dim = p["om_w"].shape[0]

    # Permute offset_mask weight rows from the canonical per-group interleave
    # [x0,y0,x1,y1,...,m0..mK-1] to [x0..xK-1, y0..yK-1, m0..mK-1]: zero runtime cost.
    perm = []
    for g in range(group):
        base = g * 3 * K
        perm += [base + 2 * k for k in range(K)]
        perm += [base + 2 * k + 1 for k in range(K)]
        perm += [base + 2 * K + k for k in range(K)]
    perm += list(range(nom, om_dim))
    perm = jnp.asarray(perm, jnp.int32)
    om_w = p["om_w"][perm]
    om_b = p["om_b"][perm]

    # Fused value_proj + offset_mask pass: x read from HBM once, two lane-dense outputs
    # (value bf16, offsets/mask f32) -> no f32 slab round-trip, no host-side slice/cast.
    value, om = matmul_2out(
        x_nlc.reshape(N * L, C),
        p["vp_w"].T.astype(jnp.bfloat16), om_w.T.astype(jnp.bfloat16),
        p["vp_b"], om_b, act=False, dta=jnp.bfloat16, dtb=jnp.float32)
    value = value.reshape(N, L, C)
    om = om.reshape(N, L, om_dim)

    tl_out = min(tl_out, L)
    tl_in = min(tl_in, L)
    lcm = math.lcm(tl_out, tl_in)
    Lp = int(pl.cdiv(L, lcm)) * lcm
    if Lp != L:
        value = jnp.pad(value, ((0, 0), (0, Lp - L), (0, 0)))
        om = jnp.pad(om, ((0, 0), (0, Lp - L), (0, 0)))
    n_out = Lp // tl_out
    n_in = Lp // tl_in

    if full_range:   # reference path (no skipping) for self-checks
        jmin = jnp.zeros((N * n_out,), jnp.int32)
        jmax = jnp.full((N * n_out,), n_in - 1, jnp.int32)
    else:
        jmin, jmax = _touched_tile_range(om, H, W, group, K, ksize, pad, dil,
                                         offset_scale, tl_out, tl_in)

    opw = p["op_w"].T.astype(jnp.bfloat16)      # (C, C)  output_proj folded into epilogue
    opb = p["op_b"].reshape(1, C).astype(jnp.float32)
    gc = C // group

    out = pl.pallas_call(
        functools.partial(_dcn_kernel, H=H, W=W, G=group, K=K, ksize=ksize, pad=pad,
                          dil=dil, offset_scale=offset_scale, tl_out=tl_out, tl_in=tl_in,
                          n_out_tiles=n_out),
        out_shape=jax.ShapeDtypeStruct((N, Lp, C), out_dtype),
        grid_spec=pltpu.PrefetchScalarGridSpec(
            num_scalar_prefetch=2,
            grid=(N, n_out, n_in),
            in_specs=[
                # value DMA is clamped to the touched range: repeated block indices are not
                # re-fetched, so untouched input tiles are never DMA'd from HBM.
                pl.BlockSpec(
                    (1, tl_in, C),
                    lambda n, i, j, jmn, jmx: (
                        n,
                        jnp.minimum(jnp.maximum(j, jmn[n * n_out + i]),
                                    jmx[n * n_out + i]),
                        0)),
                pl.BlockSpec((1, tl_out, om_dim), lambda n, i, j, *_: (n, i, 0)),
                pl.BlockSpec((C, C), lambda n, i, j, *_: (0, 0)),
                pl.BlockSpec((1, C), lambda n, i, j, *_: (0, 0)),
            ],
            out_specs=pl.BlockSpec((1, tl_out, C), lambda n, i, j, *_: (n, i, 0)),
            scratch_shapes=[pltpu.VMEM((group, tl_out, gc), jnp.float32)],
        ),
        compiler_params=pltpu.CompilerParams(
            dimension_semantics=("parallel", "parallel", "arbitrary")),
    )(jmin, jmax, value, om, opw, opb)
    return out[:, :L] if Lp != L else out


# --------------------------------------------------------------------------------------
# Host-side parameter folding (tiny tensors).
# --------------------------------------------------------------------------------------
def _bn_fold(p):
    scale = p["g"] / jnp.sqrt(p["v"] + BN_EPS)
    bias = p["b"] - p["m"] * scale
    return scale, bias


def _conv1x1_mat(p):
    """PyTorch (Cout, Cin, 1, 1) conv + BN -> bf16 (Cin, Cout) with scale folded, f32 bias."""
    scale, bias = _bn_fold(p)
    w = p["w"].reshape(p["w"].shape[0], p["w"].shape[1])            # (Cout, Cin)
    wm = (w.T * scale[None, :]).astype(jnp.bfloat16)
    return wm, bias.astype(jnp.float32)


def _conv3x3_mat(p):
    """PyTorch (Cout, Cin, 3, 3) conv + BN -> bf16 (9*Cin, Cout) (rows ordered kh,kw,ci)."""
    scale, bias = _bn_fold(p)
    cout, cin = p["w"].shape[0], p["w"].shape[1]
    wm = jnp.transpose(p["w"], (2, 3, 1, 0)).reshape(9 * cin, cout)
    wm = (wm * scale[None, :]).astype(jnp.bfloat16)
    return wm, bias.astype(jnp.float32)


# --------------------------------------------------------------------------------------
# Module glue.
# --------------------------------------------------------------------------------------
def bottleneck(y1_nlc, p, H, W):
    """Bottleneck(shortcut=False): 3x3 Conv(BN,SiLU), then DCNv4."""
    wm, bias = _conv3x3_mat(p["cv1"])
    t = conv3x3_bn_silu(y1_nlc, wm, bias, H, W)
    return dcnv4(t, p["dcn"], H, W)


def c2f_dcnv4(x_nchw, params):
    N, C1, H, W = x_nchw.shape
    L = H * W
    c = params["c"]
    x = jnp.transpose(x_nchw, (0, 2, 3, 1)).reshape(N * L, C1).astype(jnp.bfloat16)

    # cv1: 1x1 Conv + BN + SiLU, emitting the two C2f chunks as separate lane-dense outputs
    # (chunk(2,1) costs nothing; the 3x3 conv only DMAs its own channels).
    w1, b1 = _conv1x1_mat(params["cv1"])
    y0, y1 = matmul_2out(x, w1[:, :c], w1[:, c:], b1[:c], b1[c:],
                         act=True, dta=jnp.bfloat16, dtb=jnp.bfloat16)

    d = bottleneck(y1.reshape(N, L, c), params["m0"], H, W)          # (N, L, c) bf16

    # cv2 over the implicit concat([y0, y1, d]) via weight row blocks; bf16 output write.
    w2, b2 = _conv1x1_mat(params["cv2"])                             # (3c, c2)
    out = matmul_cat3(y0, y1, d.reshape(N * L, c),
                      w2[:c], w2[c:2 * c], w2[2 * c:], b2,
                      act=True, out_dtype=jnp.bfloat16)
    c2 = out.shape[-1]
    # NCHW f32 to match the PyTorch interface; keep NHWC/bf16 upstream if the consumer allows.
    return jnp.transpose(out.reshape(N, H, W, c2), (0, 3, 1, 2)).astype(jnp.float32)


# --------------------------------------------------------------------------------------
# Deterministic synthetic parameters (no checkpoint loading).
# --------------------------------------------------------------------------------------
def _conv_params(key, cin, cout, k):
    k1, k2, k3, k4, k5 = jax.random.split(key, 5)
    return dict(
        w=jax.random.normal(k1, (cout, cin, k, k), jnp.float32) / math.sqrt(cin * k * k),
        g=1.0 + 0.1 * jax.random.normal(k2, (cout,), jnp.float32),
        b=0.1 * jax.random.normal(k3, (cout,), jnp.float32),
        m=0.1 * jax.random.normal(k4, (cout,), jnp.float32),
        v=1.0 + 0.1 * jnp.abs(jax.random.normal(k5, (cout,), jnp.float32)),
    )


def _dcn_params(key, C, group=4, K=9):
    k1, k2, k3, k4, k5, k6 = jax.random.split(key, 6)
    om_dim = int(math.ceil((group * K * 3) / 8) * 8)
    # TODO(synk): reference DCNv4 zero-inits the offset_mask linear; small random init here so
    # the deformable sampling path (and tile skipping) is actually exercised.
    return dict(
        vp_w=jax.random.normal(k1, (C, C), jnp.float32) / math.sqrt(C),
        vp_b=0.1 * jax.random.normal(k2, (C,), jnp.float32),
        om_w=0.1 * jax.random.normal(k3, (om_dim, C), jnp.float32),
        om_b=0.1 * jax.random.normal(k4, (om_dim,), jnp.float32),
        op_w=jax.random.normal(k5, (C, C), jnp.float32) / math.sqrt(C),
        op_b=0.1 * jax.random.normal(k6, (C,), jnp.float32),
    )


def init_params(key, c1, c2, n=1, group=4):
    assert n == 1, "this synthetic script instantiates n=1"
    c = int(c2 * 0.5)
    k1, k2, k3, k4 = jax.random.split(key, 4)
    return dict(
        c=c,
        cv1=_conv_params(k1, c1, 2 * c, 1),
        cv2=_conv_params(k2, (2 + n) * c, c2, 1),
        m0=dict(
            cv1=_conv_params(k3, c, c, 3),      # Bottleneck.cv1, e=1.0 -> c_ = c
            dcn=_dcn_params(k4, c, group=group),
        ),
    )


if __name__ == "__main__":
    key = jax.random.PRNGKey(0)
    kx, kp, kt = jax.random.split(key, 3)
    c1, c2, n = 16, 32, 1
    N, H, W = 2, 16, 16
    x = jax.random.normal(kx, (N, c1, H, W), jnp.float32)
    params = init_params(kp, c1, c2, n)

    out = jax.block_until_ready(c2f_dcnv4(x, params))
    assert out.shape == (N, c2, H, W), out.shape
    assert bool(jnp.all(jnp.isfinite(out)))

    c = params["c"]

    # Self-check (a): tile-skipping + clamped DMA must match the full-range path exactly,
    # and the DCN core must be invariant to the (tl_out, tl_in) tiling.
    xt = jax.random.normal(kt, (N, H * W, c), jnp.float32).astype(jnp.bfloat16)
    d_skip = dcnv4(xt, params["m0"]["dcn"], H, W, tl_out=256, tl_in=128)
    d_full = dcnv4(xt, params["m0"]["dcn"], H, W, tl_out=256, tl_in=128, full_range=True)
    d_alt = dcnv4(xt, params["m0"]["dcn"], H, W, tl_out=128, tl_in=128)
    assert bool(jnp.allclose(d_skip.astype(jnp.float32), d_full.astype(jnp.float32),
                             rtol=1e-2, atol=1e-2))
    assert bool(jnp.allclose(d_skip.astype(jnp.float32), d_alt.astype(jnp.float32),
                             rtol=2e-2, atol=2e-2))

    # Self-check (b): row-band tiled 3x3 conv with halo rows vs XLA conv reference.
    xc = jax.random.normal(kt, (N, H * W, c), jnp.float32).astype(jnp.bfloat16)
    wm, bias = _conv3x3_mat(params["m0"]["cv1"])
    got = conv3x3_bn_silu(xc, wm, bias, H, W, band_rows=4).astype(jnp.float32)
    xim = xc.astype(jnp.float32).reshape(N, H, W, c)
    wref = wm.astype(jnp.float32).reshape(3, 3, c, c)                # HWIO, BN scale folded
    ref = jax.lax.conv_general_dilated(xim, wref, (1, 1), "SAME",
                                       dimension_numbers=("NHWC", "HWIO", "NHWC"))
    ref = ref + bias.reshape(1, 1, 1, c)
    ref = ref * jax.nn.sigmoid(ref)
    assert bool(jnp.allclose(got, ref.reshape(N, H * W, c), rtol=3e-2, atol=3e-2))

    print("KERNEL_OK")
</pallas_src>

<mosaic_0001>
module attributes {stable_mosaic.version = 11 : i64} {
  func.func @_mm2out_kernel(%arg0: i32, %arg1: memref<512x16xbf16, #tpu.memory_space<vmem>>, %arg2: memref<16x16xbf16, #tpu.memory_space<vmem>>, %arg3: memref<16x16xbf16, #tpu.memory_space<vmem>>, %arg4: memref<1x16xf32, #tpu.memory_space<vmem>>, %arg5: memref<1x16xf32, #tpu.memory_space<vmem>>, %arg6: memref<512x16xbf16, #tpu.memory_space<vmem>>, %arg7: memref<512x16xbf16, #tpu.memory_space<vmem>>) attributes {dimension_semantics = [#tpu.dimension_semantics<parallel>], iteration_bounds = array<i64: 1>, scalar_prefetch = 0 : i64, scratch_operands = 0 : i64, tpu.core_type = #tpu.core_type<tc>, window_params = [{transform_indices = @transform_0, window_bounds = array<i64: 512, 16>}, {pipeline_mode = #tpu.pipeline_mode<synchronous>, transform_indices = @transform_1, window_bounds = array<i64: 16, 16>}, {pipeline_mode = #tpu.pipeline_mode<synchronous>, transform_indices = @transform_2, window_bounds = array<i64: 16, 16>}, {pipeline_mode = #tpu.pipeline_mode<synchronous>, transform_indices = @transform_3, window_bounds = array<i64: 1, 16>}, {pipeline_mode = #tpu.pipeline_mode<synchronous>, transform_indices = @transform_4, window_bounds = array<i64: 1, 16>}, {transform_indices = @transform_5, window_bounds = array<i64: 512, 16>}, {transform_indices = @transform_6, window_bounds = array<i64: 512, 16>}]} {
    %c0 = arith.constant 0 : index
    %c0_0 = arith.constant 0 : index
    %0 = vector.load %arg1[%c0, %c0_0] : memref<512x16xbf16, #tpu.memory_space<vmem>>, vector<512x16xbf16>
    %c0_1 = arith.constant 0 : index
    %c0_2 = arith.constant 0 : index
    %1 = vector.load %arg2[%c0_1, %c0_2] : memref<16x16xbf16, #tpu.memory_space<vmem>>, vector<16x16xbf16>
    %cst = arith.constant dense<0.000000e+00> : vector<512x16xf32>
    %2 = tpu.matmul %0, %1, %cst {dimension_numbers = #tpu.dot_dimension_numbers<[1], [0], [0], [1], [0, 0, 1, 1], [], []>} : vector<512x16xbf16>, vector<16x16xbf16>, vector<512x16xf32> -> vector<512x16xf32>
    %c0_3 = arith.constant 0 : index
    %c0_4 = arith.constant 0 : index
    %3 = vector.load %arg4[%c0_3, %c0_4] : memref<1x16xf32, #tpu.memory_space<vmem>>, vector<1x16xf32>
    %4 = vector.broadcast %3 : vector<1x16xf32> to vector<512x16xf32>
    %5 = arith.addf %2, %4 : vector<512x16xf32>
    %c0_5 = arith.constant 0 : index
    %c0_6 = arith.constant 0 : index
    %6 = vector.load %arg3[%c0_5, %c0_6] : memref<16x16xbf16, #tpu.memory_space<vmem>>, vector<16x16xbf16>
    %cst_7 = arith.constant dense<0.000000e+00> : vector<512x16xf32>
    %7 = tpu.matmul %0, %6, %cst_7 {dimension_numbers = #tpu.dot_dimension_numbers<[1], [0], [0], [1], [0, 0, 1, 1], [], []>} : vector<512x16xbf16>, vector<16x16xbf16>, vector<512x16xf32> -> vector<512x16xf32>
    %c0_8 = arith.constant 0 : index
    %c0_9 = arith.constant 0 : index
    %8 = vector.load %arg5[%c0_8, %c0_9] : memref<1x16xf32, #tpu.memory_space<vmem>>, vector<1x16xf32>
    %9 = vector.broadcast %8 : vector<1x16xf32> to vector<512x16xf32>
    %10 = arith.addf %7, %9 : vector<512x16xf32>
    %cst_10 = arith.constant 0.000000e+00 : f32
    %11 = vector.broadcast %cst_10 : f32 to vector<512x16xf32>
    %12 = arith.subf %11, %5 : vector<512x16xf32>
    %13 = math.exp %12 : vector<512x16xf32>
    %cst_11 = arith.constant 1.000000e+00 : f32
    %14 = vector.broadcast %cst_11 : f32 to vector<512x16xf32>
    %15 = arith.addf %14, %13 : vector<512x16xf32>
    %16 = tpu.reciprocal %15 {approx = true} : vector<512x16xf32> -> vector<512x16xf32>
    %17 = arith.mulf %5, %16 : vector<512x16xf32>
    %cst_12 = arith.constant 0.000000e+00 : f32
    %18 = vector.broadcast %cst_12 : f32 to vector<512x16xf32>
    %19 = arith.subf %18, %10 : vector<512x16xf32>
    %20 = math.exp %19 : vector<512x16xf32>
    %cst_13 = arith.constant 1.000000e+00 : f32
    %21 = vector.broadcast %cst_13 : f32 to vector<512x16xf32>
    %22 = arith.addf %21, %20 : vector<512x16xf32>
    %23 = tpu.reciprocal %22 {approx = true} : vector<512x16xf32> -> vector<512x16xf32>
    %24 = arith.mulf %10, %23 : vector<512x16xf32>
    %25 = arith.truncf %17 : vector<512x16xf32> to vector<512x16xbf16>
    %c0_14 = arith.constant 0 : index
    %c0_15 = arith.constant 0 : index
    %26 = vector.load %arg6[%c0_14, %c0_15] : memref<512x16xbf16, #tpu.memory_space<vmem>>, vector<512x16xbf16>
    tpu.vector_store %arg6[%c0_14, %c0_15], %25 {strides = array<i32>} : memref<512x16xbf16, #tpu.memory_space<vmem>>, vector<512x16xbf16>,
    %27 = arith.truncf %24 : vector<512x16xf32> to vector<512x16xbf16>
    %c0_16 = arith.constant 0 : index
    %c0_17 = arith.constant 0 : index
    %28 = vector.load %arg7[%c0_16, %c0_17] : memref<512x16xbf16, #tpu.memory_space<vmem>>, vector<512x16xbf16>
    tpu.vector_store %arg7[%c0_16, %c0_17], %27 {strides = array<i32>} : memref<512x16xbf16, #tpu.memory_space<vmem>>, vector<512x16xbf16>,
    return
  }
  func.func @transform_0(%arg0: i32) -> (i32, i32) {
    %c0_i32 = arith.constant 0 : i32
    %c0_i32_0 = arith.constant 0 : i32
    return %arg0, %c0_i32 : i32, i32
  }
  func.func @transform_1(%arg0: i32) -> (i32, i32) {
    %c0_i32 = arith.constant 0 : i32
    %c0_i32_0 = arith.constant 0 : i32
    %c0_i32_1 = arith.constant 0 : i32
    return %c0_i32, %c0_i32_0 : i32, i32
  }
  func.func @transform_2(%arg0: i32) -> (i32, i32) {
    %c0_i32 = arith.constant 0 : i32
    %c0_i32_0 = arith.constant 0 : i32
    %c0_i32_1 = arith.constant 0 : i32
    return %c0_i32, %c0_i32_0 : i32, i32
  }
  func.func @transform_3(%arg0: i32) -> (i32, i32) {
    %c0_i32 = arith.constant 0 : i32
    %c0_i32_0 = arith.constant 0 : i32
    %c0_i32_1 = arith.constant 0 : i32
    return %c0_i32, %c0_i32_0 : i32, i32
  }
  func.func @transform_4(%arg0: i32) -> (i32, i32) {
    %c0_i32 = arith.constant 0 : i32
    %c0_i32_0 = arith.constant 0 : i32
    %c0_i32_1 = arith.constant 0 : i32
    return %c0_i32, %c0_i32_0 : i32, i32
  }
  func.func @transform_5(%arg0: i32) -> (i32, i32) {
    %c0_i32 = arith.constant 0 : i32
    %c0_i32_0 = arith.constant 0 : i32
    return %arg0, %c0_i32 : i32, i32
  }
  func.func @transform_6(%arg0: i32) -> (i32, i32) {
    %c0_i32 = arith.constant 0 : i32
    %c0_i32_0 = arith.constant 0 : i32
    return %arg0, %c0_i32 : i32, i32
  }
}

</mosaic_0001>

<bundles_post_ra>
// kernel: tpu_custom_call.1
= control target key start
LH: loop header
LB: loop body
LE: loop exit
PB: predicated region body
PF: predicated region fallthrough
CT: control target
= control target key end

     0   :  { %vm262_vm0 = vcmask 130048   ;;  %vm1976_vm1 = vcmask 125952   ;;  %s5285_s1 = inlined_call_operand.vmem [shape: bf16[16,16], index: 1, kind: input, shape index: {}]   ;;  %s5286_s2 = inlined_call_operand.vmem [shape: bf16[16,16], index: 2, kind: input, shape index: {}]   ;;  %s5287_s0 = inlined_call_operand.vmem [shape: bf16[512,16], index: 0, kind: input, shape index: {}]   ;;  %s5288_s3 = inlined_call_operand.vmem [shape: f32[1,16], index: 3, kind: input, shape index: {}]   ;;  %s5289_s4 = inlined_call_operand.vmem [shape: f32[1,16], index: 4, kind: input, shape index: {}]   ;;  %s5290_s5 = inlined_call_operand.vmem [shape: bf16[512,16], index: 5, kind: output, shape index: {0}]   ;;  %s5291_s6 = inlined_call_operand.vmem [shape: bf16[512,16], index: 6, kind: output, shape index: {1}]  }
   0x1   :  { %v2923_v0 = vld [vmem:[%s5285_s1] sm:$0xff]   ;;  %v2926_v3 = vld [vmem:[%s5287_s0 + $0x8] sm:$0xff]   ;;  %v2927_v4 = vld [vmem:[%s5287_s0 + $0x10] sm:$0xff]  }
   0x2   :  { %v2924_v1 = vld [vmem:[%s5286_s2] sm:$0xff]   ;;  %2791 = vmatprep.subr.bf16.mxu0 %v2923_v0  ;;  %v2928_v5 = vld [vmem:[%s5287_s0 + $0x18] sm:$0xff]   ;;  %v2930_v7 = vld [vmem:[%s5287_s0 + $0x28] sm:$0xff]  }
   0x3   :  { %v2925_v2 = vld [vmem:[%s5287_s0] sm:$0xff]   ;;  %2857 = vmatprep.subr.bf16.mxu1 %v2924_v1  ;;  %2792 = vmatpush3.bf16.msra.mxu0 %v2923_v0  ;;  %v2931_v8 = vld [vmem:[%s5287_s0 + $0x30] sm:$0xff]   ;;  %v2932_v9 = vld [vmem:[%s5287_s0 + $0x38] sm:$0xff]  }
   0x4   :  { %2858 = vmatpush3.bf16.msra.mxu1 %v2924_v1  ;;  %2793 = vmatprep.mubr.msk.bf16.mxu0 %vm262_vm0, %v2925_v2  ;;  %v2929_v6 = vld [vmem:[%s5287_s0 + $0x20] sm:$0xff]   ;;  %v2934_v11 = vld [vmem:[%s5287_s0 + $0x48] sm:$0xff]   ;;  %v2935_v12 = vld [vmem:[%s5287_s0 + $0x50] sm:$0xff]  }
   0x5   :  { %2859 = vmatprep.mubr.msk.bf16.mxu1 %vm262_vm0, %v2925_v2  ;;  %v2933_v10 = vld [vmem:[%s5287_s0 + $0x40] sm:$0xff]   ;;  %v2936_v13 = vld [vmem:[%s5287_s0 + $0x58] sm:$0xff]   ;;  %v2938_v15 = vld [vmem:[%s5287_s0 + $0x68] sm:$0xff]  }
   0x6   :  { %2794 = vmatmul.mubr.msk.bf16.vlgmr.msra.gmra.mrb[0].mxu0 %vm262_vm0, %v2926_v3  ;;  %v2937_v14 = vld [vmem:[%s5287_s0 + $0x60] sm:$0xff]   ;;  %v2939_v16 = vld [vmem:[%s5287_s0 + $0x70] sm:$0xff]   ;;  %v2940_v17 = vld [vmem:[%s5287_s0 + $0x78] sm:$0xff]  }
   0x7   :  { %2860 = vmatmul.mubr.msk.bf16.vlgmr.msra.gmra.mrb[0].mxu1 %vm262_vm0, %v2926_v3  ;;  %2797 = vmatprep.mubr.msk.bf16.mxu0 %vm262_vm0, %v2927_v4  ;;  %v2941_v18 = vld [vmem:[%s5287_s0 + $0x80] sm:$0xff]   ;;  %v2942_v19 = vld [vmem:[%s5287_s0 + $0x88] sm:$0xff]   ;;  %v2943_v20 = vld [vmem:[%s5287_s0 + $0x90] sm:$0xff]  }
   0x8   :  { %2863 = vmatprep.mubr.msk.bf16.mxu1 %vm262_vm0, %v2927_v4  ;;  %v2944_v21 = vld [vmem:[%s5287_s0 + $0x98] sm:$0xff]   ;;  %v2945_v22 = vld [vmem:[%s5287_s0 + $0xa0] sm:$0xff]   ;;  %v2946_v23 = vld [vmem:[%s5287_s0 + $0xa8] sm:$0xff]  }
   0x9   :  { %v2947_v24 = vld [vmem:[%s5287_s0 + $0xb0] sm:$0xff]   ;;  %v2948_v25 = vld [vmem:[%s5287_s0 + $0xb8] sm:$0xff]   ;;  %v2949_v26 = vld [vmem:[%s5287_s0 + $0xc0] sm:$0xff]  }
   0xa   :  { %v2950_v27 = vld [vmem:[%s5287_s0 + $0xc8] sm:$0xff]   ;;  %v2951_v28 = vld [vmem:[%s5287_s0 + $0xd0] sm:$0xff]   ;;  %v2952_v29 = vld [vmem:[%s5287_s0 + $0xd8] sm:$0xff]  }
   0xb   :  { %v2953_v30 = vld [vmem:[%s5287_s0 + $0xe0] sm:$0xff]   ;;  %v2954_v31 = vld [vmem:[%s5287_s0 + $0xe8] sm:$0xff]   ;;  %v2955_v32 = vld [vmem:[%s5287_s0 + $0xf0] sm:$0xff]  }
   0xc   :  { %v2956_v33 = vld [vmem:[%s5287_s0 + $0xf8] sm:$0xff]   ;;  %v3677_v34 = vld [vmem:[%s5288_s3] ss:$0 sm:$0xff] }
   0xd   :  { %v3682_v35 = vld [vmem:[%s5289_s4] ss:$0 sm:$0xff] }
   0xe   :  { %2798 = vmatmul.mubr.msk.bf16.gmra.mrb[4].mxu0 %vm262_vm0, %v2928_v5 }
   0xf   :  { %2864 = vmatmul.mubr.msk.bf16.gmra.mrb[4].mxu1 %vm262_vm0, %v2928_v5  ;;  %2801 = vmatprep.mubr.msk.bf16.mxu0 %vm262_vm0, %v2929_v6 }
  0x10   :  { %2867 = vmatprep.mubr.msk.bf16.mxu1 %vm262_vm0, %v2929_v6 }
  0x16   :  { %2802 = vmatmul.mubr.msk.bf16.gmra.mrb[8].mxu0 %vm262_vm0, %v2930_v7 }
  0x17   :  { %2868 = vmatmul.mubr.msk.bf16.gmra.mrb[8].mxu1 %vm262_vm0, %v2930_v7  ;;  %2805 = vmatprep.mubr.msk.bf16.mxu0 %vm262_vm0, %v2931_v8 }
  0x18   :  { %2871 = vmatprep.mubr.msk.bf16.mxu1 %vm262_vm0, %v2931_v8 }
  0x1e   :  { %2806 = vmatmul.mubr.msk.bf16.gmra.mrb[12].mxu0 %vm262_vm0, %v2932_v9 }
  0x1f   :  { %2872 = vmatmul.mubr.msk.bf16.gmra.mrb[12].mxu1 %vm262_vm0, %v2932_v9  ;;  %2809 = vmatprep.mubr.msk.bf16.mxu0 %vm262_vm0, %v2933_v10 }
  0x20   :  { %2875 = vmatprep.mubr.msk.bf16.mxu1 %vm262_vm0, %v2933_v10 }
  0x26   :  { %2810 = vmatmul.mubr.msk.bf16.gmra.mrb[16].mxu0 %vm262_vm0, %v2934_v11 }
  0x27   :  { %2876 = vmatmul.mubr.msk.bf16.gmra.mrb[16].mxu1 %vm262_vm0, %v2934_v11  ;;  %2813 = vmatprep.mubr.msk.bf16.mxu0 %vm262_vm0, %v2935_v12 }
  0x28   :  { %2879 = vmatprep.mubr.msk.bf16.mxu1 %vm262_vm0, %v2935_v12 }
  0x2e   :  { %2814 = vmatmul.mubr.msk.bf16.gmra.mrb[20].mxu0 %vm262_vm0, %v2936_v13 }
  0x2f   :  { %2880 = vmatmul.mubr.msk.bf16.gmra.mrb[20].mxu1 %vm262_vm0, %v2936_v13  ;;  %2817 = vmatprep.mubr.msk.bf16.mxu0 %vm262_vm0, %v2937_v14 }
  0x30   :  { %2883 = vmatprep.mubr.msk.bf16.mxu1 %vm262_vm0, %v2937_v14 }
  0x36   :  { %2818 = vmatmul.mubr.msk.bf16.gmra.mrb[24].mxu0 %vm262_vm0, %v2938_v15 }
  0x37   :  { %2884 = vmatmul.mubr.msk.bf16.gmra.mrb[24].mxu1 %vm262_vm0, %v2938_v15  ;;  %2821 = vmatprep.mubr.msk.bf16.mxu0 %vm262_vm0, %v2939_v16 }
  0x38   :  { %2887 = vmatprep.mubr.msk.bf16.mxu1 %vm262_vm0, %v2939_v16 }
  0x3e   :  { %2822 = vmatmul.mubr.msk.bf16.gmra.mrb[28].mxu0 %vm262_vm0, %v2940_v17 }
  0x3f   :  { %2888 = vmatmul.mubr.msk.bf16.gmra.mrb[28].mxu1 %vm262_vm0, %v2940_v17  ;;  %2825 = vmatprep.mubr.msk.bf16.mxu0 %vm262_vm0, %v2941_v18 }
  0x40   :  { %2891 = vmatprep.mubr.msk.bf16.mxu1 %vm262_vm0, %v2941_v18 }
  0x46   :  { %2826 = vmatmul.mubr.msk.bf16.gmra.mrb[32].mxu0 %vm262_vm0, %v2942_v19 }
  0x47   :  { %2892 = vmatmul.mubr.msk.bf16.gmra.mrb[32].mxu1 %vm262_vm0, %v2942_v19  ;;  %2829 = vmatprep.mubr.msk.bf16.mxu0 %vm262_vm0, %v2943_v20 }
  0x48   :  { %2895 = vmatprep.mubr.msk.bf16.mxu1 %vm262_vm0, %v2943_v20 }
  0x4e   :  { %2830 = vmatmul.mubr.msk.bf16.gmra.mrb[36].mxu0 %vm262_vm0, %v2944_v21 }
  0x4f   :  { %2896 = vmatmul.mubr.msk.bf16.gmra.mrb[36].mxu1 %vm262_vm0, %v2944_v21  ;;  %2833 = vmatprep.mubr.msk.bf16.mxu0 %vm262_vm0, %v2945_v22 }
  0x50   :  { %2899 = vmatprep.mubr.msk.bf16.mxu1 %vm262_vm0, %v2945_v22 }
  0x56   :  { %2834 = vmatmul.mubr.msk.bf16.gmra.mrb[40].mxu0 %vm262_vm0, %v2946_v23 }
  0x57   :  { %2900 = vmatmul.mubr.msk.bf16.gmra.mrb[40].mxu1 %vm262_vm0, %v2946_v23  ;;  %2837 = vmatprep.mubr.msk.bf16.mxu0 %vm262_vm0, %v2947_v24 }
  0x58   :  { %2903 = vmatprep.mubr.msk.bf16.mxu1 %vm262_vm0, %v2947_v24 }
  0x5e   :  { %2838 = vmatmul.mubr.msk.bf16.gmra.mrb[44].mxu0 %vm262_vm0, %v2948_v25 }
  0x5f   :  { %2904 = vmatmul.mubr.msk.bf16.gmra.mrb[44].mxu1 %vm262_vm0, %v2948_v25  ;;  %2841 = vmatprep.mubr.msk.bf16.mxu0 %vm262_vm0, %v2949_v26 }
  0x60   :  { %2907 = vmatprep.mubr.msk.bf16.mxu1 %vm262_vm0, %v2949_v26 }
  0x66   :  { %2842 = vmatmul.mubr.msk.bf16.gmra.mrb[48].mxu0 %vm262_vm0, %v2950_v27 }
  0x67   :  { %2908 = vmatmul.mubr.msk.bf16.gmra.mrb[48].mxu1 %vm262_vm0, %v2950_v27  ;;  %2845 = vmatprep.mubr.msk.bf16.mxu0 %vm262_vm0, %v2951_v28 }
  0x68   :  { %2911 = vmatprep.mubr.msk.bf16.mxu1 %vm262_vm0, %v2951_v28 }
  0x6e   :  { %2846 = vmatmul.mubr.msk.bf16.gmra.mrb[52].mxu0 %vm262_vm0, %v2952_v29 }
  0x6f   :  { %2912 = vmatmul.mubr.msk.bf16.gmra.mrb[52].mxu1 %vm262_vm0, %v2952_v29  ;;  %2849 = vmatprep.mubr.msk.bf16.mxu0 %vm262_vm0, %v2953_v30 }
  0x70   :  { %2915 = vmatprep.mubr.msk.bf16.mxu1 %vm262_vm0, %v2953_v30 }
  0x76   :  { %2850 = vmatmul.mubr.msk.bf16.gmra.mrb[56].mxu0 %vm262_vm0, %v2954_v31 }
  0x77   :  { %2916 = vmatmul.mubr.msk.bf16.gmra.mrb[56].mxu1 %vm262_vm0, %v2954_v31  ;;  %2853 = vmatprep.mubr.msk.bf16.mxu0 %vm262_vm0, %v2955_v32 }
  0x78   :  { %2919 = vmatprep.mubr.msk.bf16.mxu1 %vm262_vm0, %v2955_v32 }
  0x7e   :  { %2854 = vmatmul.mubr.msk.bf16.gmra.mrb[60].mxu0 %vm262_vm0, %v2956_v33 }
  0x7f   :  { %2920 = vmatmul.mubr.msk.bf16.gmra.mrb[60].mxu1 %vm262_vm0, %v2956_v33 }
  0xd9   :  { %v2795_v36 = vpop.f32.mrb[0].mxu0 }
  0xda   :  { %v3685_v37 = vadd.f32 %v2795_v36, %v3677_v34  ;;  %v2861_v38 = vpop.f32.mrb[0].mxu1  ;;  %v393_v39 = vpop.f32.mrb[1].mxu0 }
  0xdb   :  { %v3688_v40 = vadd.f32 %v2861_v38, %v3682_v35  ;;  %v3691_v41 = vadd.f32 %v3677_v34, %v393_v39  ;;  %v697_v42 = vpop.f32.mrb[1].mxu1  ;;  %v2796_v43 = vpop.f32.mrb[2].mxu0 }
  0xdc   :  { %v954_v44 = vsub.f32 0.0, %v3685_v37  ;;  %v3695_v45 = vadd.f32 %v3682_v35, %v697_v42  ;;  %v3698_v46 = vadd.f32 %v2796_v43, %v3677_v34  ;;  %v2862_v47 = vpop.f32.mrb[2].mxu1  ;;  %v396_v48 = vpop.f32.mrb[3].mxu0 }
  0xdd   :  { %v1338_v49 = vsub.f32 0.0, %v3688_v40  ;;  %v952_v50 = vsub.f32 0.0, %v3691_v41  ;;  %v3703_v51 = vadd.f32 %v2862_v47, %v3682_v35  ;;  %v3706_v52 = vadd.f32 %v3677_v34, %v396_v48  ;;  %v700_v53 = vpop.f32.mrb[3].mxu1 }
  0xde   :  { %v1020_v54 = vmul.f32 1.442695, %v954_v44  ;;  %v1336_v55 = vsub.f32 0.0, %v3695_v45  ;;  %v955_v56 = vsub.f32 0.0, %v3698_v46  ;;  %v3711_v57 = vadd.f32 %v3682_v35, %v700_v53 }
  0xdf   :  { %v1404_v58 = vmul.f32 1.442695, %v1338_v49  ;;  %v1016_v59 = vmul.f32 1.442695, %v952_v50  ;;  %v1339_v60 = vsub.f32 0.0, %v3703_v51  ;;  %v953_v61 = vsub.f32 0.0, %v3706_v52 }
  0xe0   :  { %2957 = vpow2.f32 %v1020_v54  ;;  %v1400_v62 = vmul.f32 1.442695, %v1336_v55  ;;  %v1022_v63 = vmul.f32 1.442695, %v955_v56  ;;  %v1337_v0 = vsub.f32 0.0, %v3711_v57 }
  0xe1   :  { %2959 = vpow2.f32 %v1404_v58  ;;  %v1406_v1 = vmul.f32 1.442695, %v1339_v60  ;;  %v2799_v2 = vpop.f32.mrb[4].mxu0  ;;  %v1018_v3 = vmul.f32 1.442695, %v953_v61 }
  0xe2   :  { %2961 = vpow2.f32 %v1016_v59  ;;  %v3717_v4 = vadd.f32 %v2799_v2, %v3677_v34  ;;  %v2865_v5 = vpop.f32.mrb[4].mxu1  ;;  %v409_v6 = vpop.f32.mrb[5].mxu0  ;;  %v1402_v7 = vmul.f32 1.442695, %v1337_v0 }
  0xe3   :  { %2963 = vpow2.f32 %v1400_v62  ;;  %v3720_v8 = vadd.f32 %v2865_v5, %v3682_v35  ;;  %v3723_v9 = vadd.f32 %v3677_v34, %v409_v6  ;;  %v713_v10 = vpop.f32.mrb[5].mxu1  ;;  %v2800_v11 = vpop.f32.mrb[6].mxu0 }
  0xe4   :  { %2965 = vpow2.f32 %v1022_v63  ;;  %v958_v12 = vsub.f32 0.0, %v3717_v4  ;;  %v3727_v13 = vadd.f32 %v3682_v35, %v713_v10  ;;  %v3730_v14 = vadd.f32 %v2800_v11, %v3677_v34  ;;  %v2866_v15 = vpop.f32.mrb[6].mxu1  ;;  %v412_v16 = vpop.f32.mrb[7].mxu0 }
  0xe5   :  { %2967 = vpow2.f32 %v1406_v1  ;;  %v1342_v17 = vsub.f32 0.0, %v3720_v8  ;;  %v956_v18 = vsub.f32 0.0, %v3723_v9  ;;  %v3735_v19 = vadd.f32 %v2866_v15, %v3682_v35  ;;  %v716_v20 = vpop.f32.mrb[7].mxu1 }
  0xe6   :  { %2969 = vpow2.f32 %v1018_v3  ;;  %v1028_v21 = vmul.f32 1.442695, %v958_v12  ;;  %v1340_v22 = vsub.f32 0.0, %v3727_v13  ;;  %v959_v23 = vsub.f32 0.0, %v3730_v14 }
  0xe7   :  { %2971 = vpow2.f32 %v1402_v7  ;;  %v1412_v24 = vmul.f32 1.442695, %v1342_v17  ;;  %v1024_v25 = vmul.f32 1.442695, %v956_v18  ;;  %v1343_v26 = vsub.f32 0.0, %v3735_v19 }
  0xe8   :  { %2973 = vpow2.f32 %v1028_v21  ;;  %v1408_v27 = vmul.f32 1.442695, %v1340_v22  ;;  %v1030_v28 = vmul.f32 1.442695, %v959_v23  ;;  %v3741_v29 = vadd.f32 %v3677_v34, %v412_v16 }
  0xe9   :  { %2975 = vpow2.f32 %v1412_v24  ;;  %v3744_v30 = vadd.f32 %v3682_v35, %v716_v20  ;;  %v2803_v31 = vpop.f32.mrb[8].mxu0  ;;  %v3746_v33 = vmul.f32 1.442695, %v1343_v26 }
  0xea   :  { %v2958_v32 = vpop.eup %2957  ;;  %2977 = vpow2.f32 %v1024_v25  ;;  %v957_v36 = vsub.f32 0.0, %v3741_v29  ;;  %v3750_v38 = vadd.f32 %v2803_v31, %v3677_v34  ;;  %v2869_v39 = vpop.f32.mrb[8].mxu1 }
  0xeb   :  { %v425_v42 = vpop.f32.mrb[9].mxu0  ;;  %v2960_v43 = vpop.eup %2959  ;;  %v1146_v44 = vadd.f32 1.0, %v2958_v32  ;;  %2979 = vpow2.f32 %v1408_v27  ;;  %v1341_v47 = vsub.f32 0.0, %v3744_v30  ;;  %v3754_v48 = vadd.f32 %v2869_v39, %v3682_v35 }
  0xec   :  { %v729_v49 = vpop.f32.mrb[9].mxu1  ;;  %v2804_v50 = vpop.f32.mrb[10].mxu0  ;;  %v1530_v54 = vadd.f32 1.0, %v2960_v43  ;;  %2981 = vpow2.f32 %v1030_v28  ;;  %v3756_v55 = vmul.f32 1.442695, %v957_v36  ;;  %v962_v56 = vsub.f32 0.0, %v3750_v38 }
  0xed   :  { %v2962_v53 = vpop.eup %2961  ;;  %v2870_v58 = vpop.f32.mrb[10].mxu1  ;;  %2983 = vrcp.f32 %v1146_v44  ;;  %v3759_v62 = vmul.f32 1.442695, %v1341_v47  ;;  %v1346_v63 = vsub.f32 0.0, %v3754_v48  ;;  %v3765_v5 = vadd.f32 %v3677_v34, %v425_v42 }
  0xee   :  { %v428_v59 = vpop.f32.mrb[11].mxu0  ;;  %v2964_v60 = vpop.eup %2963  ;;  %v1144_v61 = vadd.f32 1.0, %v2962_v53  ;;  %2985 = vrcp.f32 %v1530_v54  ;;  %v3762_v3 = vmul.f32 1.442695, %v962_v56  ;;  %v3770_v11 = vadd.f32 %v3682_v35, %v729_v49 }
  0xef   :  { %v732_v0 = vpop.f32.mrb[11].mxu1  ;;  %v2966_v1 = vpop.eup %2965  ;;  %v1528_v2 = vadd.f32 1.0, %v2964_v60  ;;  %v3767_v10 = vmul.f32 1.442695, %v1346_v63  ;;  %v960_v16 = vsub.f32 0.0, %v3765_v5  ;;  %v3774_v17 = vadd.f32 %v2804_v50, %v3677_v34 }
  0xf0   :  { %v2968_v6 = vpop.eup %2967  ;;  %2987 = vrcp.f32 %v1144_v61  ;;  %v1147_v7 = vadd.f32 1.0, %v2966_v1  ;;  %v1344_v21 = vsub.f32 0.0, %v3770_v11  ;;  %v3778_v22 = vadd.f32 %v2870_v58, %v3682_v35 }
  0xf1   :  { %v2970_v12 = vpop.eup %2969  ;;  %2989 = vrcp.f32 %v1528_v2  ;;  %v1531_v15 = vadd.f32 1.0, %v2968_v6  ;;  %v2807_v23 = vpop.f32.mrb[12].mxu0  ;;  %v3780_v26 = vmul.f32 1.442695, %v960_v16  ;;  %v963_v27 = vsub.f32 0.0, %v3774_v17 }
  0xf2   :  { %v2972_v18 = vpop.eup %2971  ;;  %2991 = vrcp.f32 %v1147_v7  ;;  %v1145_v20 = vadd.f32 1.0, %v2970_v12  ;;  %v2873_v28 = vpop.f32.mrb[12].mxu1  ;;  %v3785_v39 = vmul.f32 1.442695, %v1344_v21  ;;  %v1347_v42 = vsub.f32 0.0, %v3778_v22 }
  0xf3   :  { %v2974_v24 = vpop.eup %2973  ;;  %2993 = vrcp.f32 %v1531_v15  ;;  %v1529_v25 = vadd.f32 1.0, %v2972_v18  ;;  %v3783_v31 = vpop.f32.mrb[13].mxu0  ;;  %v3792_v50 = vmul.f32 1.442695, %v963_v27  ;;  %v3795_v53 = vadd.f32 %v3677_v34, %v428_v59 }
  0xf4   :  { %v2976_v32 = vpop.eup %2975  ;;  %2995 = vrcp.f32 %v1145_v20  ;;  %v1150_v36 = vadd.f32 1.0, %v2974_v24  ;;  %v3788_v43 = vpop.f32.mrb[13].mxu1  ;;  %v3801_v61 = vmul.f32 1.442695, %v1347_v42  ;;  %v3804_v63 = vadd.f32 %v3682_v35, %v732_v0 }
  0xf5   :  { %v3790_v44 = vpop.f32.mrb[14].mxu0  ;;  %v2978_v47 = vpop.eup %2977  ;;  %2997 = vrcp.f32 %v1529_v25  ;;  %v1534_v49 = vadd.f32 1.0, %v2976_v32  ;;  %v961_v59 = vsub.f32 0.0, %v3795_v53  ;;  %v3810_v7 = vadd.f32 %v2807_v23, %v3677_v34 }
  0xf6   :  { %v3797_v54 = vpop.f32.mrb[14].mxu1  ;;  %v3799_v56 = vpop.f32.mrb[15].mxu0  ;;  %2999 = vrcp.f32 %v1150_v36  ;;  %v1148_v60 = vadd.f32 1.0, %v2978_v47  ;;  %v1345_v16 = vsub.f32 0.0, %v3804_v63  ;;  %v3814_v18 = vadd.f32 %v2873_v28, %v3682_v35 }
  0xf7   :  { %v2980_v58 = vpop.eup %2979  ;;  %v3806_v1 = vpop.f32.mrb[15].mxu1  ;;  %3001 = vrcp.f32 %v1534_v49  ;;  %v3817_v21 = vmul.f32 1.442695, %v961_v59  ;;  %v966_v24 = vsub.f32 0.0, %v3810_v7 }
  0xf8   :  { %v2982_v2 = vpop.eup %2981  ;;  %v1532_v6 = vadd.f32 1.0, %v2980_v58  ;;  %3003 = vrcp.f32 %v1148_v60  ;;  %v3821_v27 = vmul.f32 1.442695, %v1345_v16  ;;  %v1350_v32 = vsub.f32 0.0, %v3814_v18 }
  0xf9   :  { %v2984_v12 = vpop.eup %2983  ;;  %v1151_v15 = vadd.f32 1.0, %v2982_v2  ;;  %v3824_v36 = vpop.f32.mrb[16].mxu0 }
  0xfa   :  { %v2986_v0 = vpop.eup %2985  ;;  %v1274_v20 = vmul.f32 %v2984_v12, %v3685_v37  ;;  %3005 = vrcp.f32 %v1532_v6  ;;  %v3828_v37 = vmul.f32 1.442695, %v966_v24  ;;  %v3830_v49 = vpop.f32.mrb[16].mxu1  ;;  %v3836_v6 = vmul.f32 1.442695, %v1350_v32 }
  0xfb   :  { %v2988_v25 = vpop.eup %2987  ;;  %v1658_v23 = vmul.f32 %v2986_v0, %v3688_v40  ;;  %3007 = vrcp.f32 %v1151_v15  ;;  %v3832_v58 = vpop.f32.mrb[17].mxu0 }
  0xfc   :  { %v2990_v28 = vpop.eup %2989  ;;  %v2599_v42 = vpack.c.bf16 %v1274_v20, %v1274_v20  ;;  %v1272_v47 = vmul.f32 %v2988_v25, %v3691_v41  ;;  %3009 = vpow2.f32 %v3746_v33  ;;  %v3838_v59 = vpop.f32.mrb[17].mxu1 }
  0xfd   :  { %v2992_v40 = vpop.eup %2991  ;;  %v2663_v60 = vpack.c.bf16 %v1658_v23, %v1658_v23  ;;  %v1656_v2 = vmul.f32 %v2990_v28, %v3695_v45  ;;  %3011 = vpow2.f32 %v3756_v55  ;;  %v3840_v12 = vpop.f32.mrb[18].mxu0  ;;  %v3850_v45 = vadd.f32 %v3677_v34, %v3783_v31 }
  0xfe   :  { %v2994_v41 = vpop.eup %2993  ;;  %1979 = vst.msk [vmem:[%s5290_s5 + $0x8] sm:$0xf] %vm1976_vm1, %v2599_v42  ;;  %v2597_v33 = vpack.c.bf16 %v1272_v47, %v1272_v47  ;;  %v1275_v15 = vmul.f32 %v2992_v40, %v3698_v46  ;;  %3013 = vpow2.f32 %v3759_v62  ;;  %v3852_v55 = vpop.f32.mrb[18].mxu1  ;;  %v3864_v46 = vadd.f32 %v3682_v35, %v3788_v43 }
  0xff   :  { %v3854_v16 = vpop.f32.mrb[19].mxu0  ;;  %v2996_v0 = vpop.eup %2995  ;;  %2299 = vst.msk [vmem:[%s5291_s6 + $0x8] sm:$0xf] %vm1976_vm1, %v2663_v60  ;;  %v2661_v20 = vpack.c.bf16 %v1656_v2, %v1656_v2  ;;  %v1659_v24 = vmul.f32 %v2994_v41, %v3703_v51  ;;  %3015 = vpow2.f32 %v3762_v3  ;;  %v964_v51 = vsub.f32 0.0, %v3850_v45 }
 0x100   :  { %v3866_v62 = vpop.f32.mrb[19].mxu1  ;;  %v2998_v31 = vpop.eup %2997  ;;  %1977 = vst.msk [vmem:[%s5290_s5] sm:$0xf] %vm1976_vm1, %v2597_v33  ;;  %v2600_v25 = vpack.c.bf16 %v1275_v15, %v1275_v15  ;;  %v1273_v23 = vmul.f32 %v2996_v0, %v3706_v52  ;;  %3017 = vpow2.f32 %v3767_v10  ;;  %v1348_v28 = vsub.f32 0.0, %v3864_v46 }
 0x101   :  { %v3000_v3 = vpop.eup %2999  ;;  %2297 = vst.msk [vmem:[%s5291_s6] sm:$0xf] %vm1976_vm1, %v2661_v20  ;;  %v2664_v43 = vpack.c.bf16 %v1659_v24, %v1659_v24  ;;  %v1657_v32 = vmul.f32 %v2998_v31, %v3711_v57  ;;  %3019 = vpow2.f32 %v3780_v26  ;;  %v3888_v47 = vmul.f32 1.442695, %v964_v51  ;;  %v3898_v2 = vpop.f32.mrb[20].mxu0 }
 0x102   :  { %v3002_v42 = vpop.eup %3001  ;;  %1980 = vst.msk [vmem:[%s5290_s5 + $0xc] sm:$0xf] %vm1976_vm1, %v2600_v25  ;;  %v2598_v52 = vpack.c.bf16 %v1273_v23, %v1273_v23  ;;  %v1278_v10 = vmul.f32 %v3000_v3, %v3717_v4  ;;  %3021 = vpow2.f32 %v3785_v39  ;;  %v3896_v60 = vmul.f32 1.442695, %v1348_v28  ;;  %v3912_v33 = vpop.f32.mrb[21].mxu0 }
 0x103   :  { %v3004_v40 = vpop.eup %3003  ;;  %2300 = vst.msk [vmem:[%s5291_s6 + $0xc] sm:$0xf] %vm1976_vm1, %v2664_v43  ;;  %v2662_v57 = vpack.c.bf16 %v1657_v32, %v1657_v32  ;;  %v1662_v26 = vmul.f32 %v3002_v42, %v3720_v8  ;;  %3023 = vpow2.f32 %v3792_v50  ;;  %v3908_v8 = vadd.f32 %v3790_v44, %v3677_v34  ;;  %v3910_v50 = vpop.f32.mrb[20].mxu1 }
 0x104   :  { %v3006_v4 = vpop.eup %3005  ;;  %1978 = vst.msk [vmem:[%s5290_s5 + $0x4] sm:$0xf] %vm1976_vm1, %v2598_v52  ;;  %v2603_v39 = vpack.c.bf16 %v1278_v10, %v1278_v10  ;;  %v1276_v41 = vmul.f32 %v3004_v40, %v3723_v9  ;;  %3025 = vpow2.f32 %v3801_v61  ;;  %v3922_v9 = vadd.f32 %v3797_v54, %v3682_v35  ;;  %v3924_v44 = vpop.f32.mrb[21].mxu1 }
 0x105   :  { %v3008_v15 = vpop.eup %3007  ;;  %2298 = vst.msk [vmem:[%s5291_s6 + $0x4] sm:$0xf] %vm1976_vm1, %v2662_v57  ;;  %v2667_v0 = vpack.c.bf16 %v1662_v26, %v1662_v26  ;;  %v1660_v20 = vmul.f32 %v3006_v4, %v3727_v13  ;;  %3027 = vpow2.f32 %v3817_v21  ;;  %v3926_v61 = vpop.f32.mrb[22].mxu0  ;;  %v967_v13 = vsub.f32 0.0, %v3908_v8 }
 0x106   :  { %v3010_v24 = vpop.eup %3009  ;;  %1983 = vst.msk [vmem:[%s5290_s5 + $0x18] sm:$0xf] %vm1976_vm1, %v2603_v39  ;;  %v2601_v31 = vpack.c.bf16 %v1276_v41, %v1276_v41  ;;  %v1279_v25 = vmul.f32 %v3008_v15, %v3730_v14  ;;  %3029 = vpow2.f32 %v3821_v27  ;;  %v3935_v21 = vpop.f32.mrb[22].mxu1  ;;  %v1351_v14 = vsub.f32 0.0, %v3922_v9 }
 0x107   :  { %v3937_v54 = vpop.f32.mrb[23].mxu0  ;;  %v3012_v23 = vpop.eup %3011  ;;  %2303 = vst.msk [vmem:[%s5291_s6 + $0x18] sm:$0xf] %vm1976_vm1, %v2667_v0  ;;  %v2665_v51 = vpack.c.bf16 %v1660_v20, %v1660_v20  ;;  %v1535_v3 = vadd.f32 1.0, %v3010_v24  ;;  %3031 = vpow2.f32 %v3828_v37  ;;  %v3952_v42 = vmul.f32 1.442695, %v967_v13 }
 0x108   :  { %v3945_v43 = vpop.f32.mrb[23].mxu1  ;;  %v3014_v27 = vpop.eup %3013  ;;  %1981 = vst.msk [vmem:[%s5290_s5 + $0x10] sm:$0xf] %vm1976_vm1, %v2601_v31  ;;  %v2604_v32 = vpack.c.bf16 %v1279_v25, %v1279_v25  ;;  %v1149_v28 = vadd.f32 1.0, %v3012_v23  ;;  %3033 = vpow2.f32 %v3836_v6  ;;  %v3958_v10 = vmul.f32 1.442695, %v1351_v14 }
 0x109   :  { %v3016_v52 = vpop.eup %3015  ;;  %2301 = vst.msk [vmem:[%s5291_s6 + $0x10] sm:$0xf] %vm1976_vm1, %v2665_v51  ;;  %3035 = vrcp.f32 %v1535_v3  ;;  %v1533_v37 = vadd.f32 1.0, %v3014_v27  ;;  %v3962_v40 = vadd.f32 %v3677_v34, %v3799_v56  ;;  %v3970_v26 = vadd.f32 %v3682_v35, %v3806_v1  ;;  %v3981_v0 = vpop.f32.mrb[24].mxu0 }
 0x10a   :  { %v3018_v57 = vpop.eup %3017  ;;  %1984 = vst.msk [vmem:[%s5290_s5 + $0x1c] sm:$0xf] %vm1976_vm1, %v2604_v32  ;;  %3037 = vrcp.f32 %v1149_v28  ;;  %v1154_v6 = vadd.f32 1.0, %v3016_v52  ;;  %v3974_v4 = vadd.f32 %v3824_v36, %v3677_v34  ;;  %v3979_v15 = vadd.f32 %v3830_v49, %v3682_v35  ;;  %v3985_v36 = vpop.f32.mrb[24].mxu1 }
 0x10b   :  { %v3020_v39 = vpop.eup %3019  ;;  %3039 = vrcp.f32 %v1533_v37  ;;  %v1538_v56 = vadd.f32 1.0, %v3018_v57  ;;  %v965_v41 = vsub.f32 0.0, %v3962_v40  ;;  %v1349_v1 = vsub.f32 0.0, %v3970_v26  ;;  %v3987_v25 = vpop.f32.mrb[25].mxu0 }
 0x10c   :  { %5295 = vst [vmem:[#allocation2_spill] sm:$0xff] %v3979_v15  ;;  %v3022_v20 = vpop.eup %3021  ;;  %3041 = vrcp.f32 %v1154_v6  ;;  %v1152_v24 = vadd.f32 1.0, %v3020_v39  ;;  %v970_v31 = vsub.f32 0.0, %v3974_v4  ;;  %v3991_v49 = vpop.f32.mrb[25].mxu1  ;;  %v1354_v28 = vsub.f32 0.0, %v3979_v15 }
 0x10d   :  { %v3024_v13 = vpop.eup %3023  ;;  %3043 = vrcp.f32 %v1538_v56  ;;  %v1536_v23 = vadd.f32 1.0, %v3022_v20  ;;  %v3989_v51 = vmul.f32 1.442695, %v965_v41  ;;  %v3993_v3 = vpop.f32.mrb[26].mxu0  ;;  %v3995_v32 = vmul.f32 1.442695, %v1349_v1 }
 0x10e   :  { %v3026_v14 = vpop.eup %3025  ;;  %3045 = vrcp.f32 %v1152_v24  ;;  %v1155_v27 = vadd.f32 1.0, %v3024_v13  ;;  %v3998_v52 = vpop.f32.mrb[26].mxu1  ;;  %v4000_v6 = vmul.f32 1.442695, %v970_v31  ;;  %v4004_v39 = vadd.f32 %v3677_v34, %v3832_v58 }
 0x10f   :  { %5296 = vst [vmem:[#allocation3_spill] sm:$0xff] %v3998_v52  ;;  %v3028_v37 = vpop.eup %3027  ;;  %3047 = vrcp.f32 %v1536_v23  ;;  %v1539_v57 = vadd.f32 1.0, %v3026_v14  ;;  %v4006_v56 = vpop.f32.mrb[27].mxu0  ;;  %v4012_v1 = vadd.f32 %v3682_v35, %v3838_v59  ;;  %v4016_v13 = vadd.f32 %v3840_v12, %v3677_v34 }
 0x110   :  { %5297 = vst [vmem:[#allocation4_spill] sm:$0xff] %v4004_v39  ;;  %5298 = vst [vmem:[#allocation5_spill] sm:$0xff] %v4006_v56  ;;  %v4008_v41 = vpop.f32.mrb[27].mxu1  ;;  %v3030_v20 = vpop.eup %3029  ;;  %3049 = vrcp.f32 %v1155_v27  ;;  %v1153_v24 = vadd.f32 1.0, %v3028_v37  ;;  %v968_v58 = vsub.f32 0.0, %v4004_v39  ;;  %v4021_v14 = vadd.f32 %v3852_v55, %v3682_v35 }
 0x111   :  { %5299 = vst [vmem:[#allocation6_spill] sm:$0xff] %v4008_v41  ;;  %5300 = vst [vmem:[#allocation7_spill] sm:$0xff] %v4016_v13  ;;  %v3032_v31 = vpop.eup %3031  ;;  %3051 = vrcp.f32 %v1539_v57  ;;  %v1537_v23 = vadd.f32 1.0, %v3030_v20  ;;  %v1352_v37 = vsub.f32 0.0, %v4012_v1  ;;  %v971_v59 = vsub.f32 0.0, %v4016_v13  ;;  %v4029_v20 = vpop.f32.mrb[28].mxu0 }
 0x112   :  { %v3034_v41 = vpop.eup %3033  ;;  %3053 = vrcp.f32 %v1153_v24  ;;  %v1158_v27 = vadd.f32 1.0, %v3032_v31  ;;  %v4025_v52 = vmul.f32 1.442695, %v1354_v28  ;;  %v4027_v57 = vmul.f32 1.442695, %v968_v58  ;;  %v4035_v31 = vpop.f32.mrb[28].mxu1 }
 0x113   :  { %v3036_v56 = vpop.eup %3035  ;;  %3055 = vrcp.f32 %v1537_v23  ;;  %v1542_v12 = vadd.f32 1.0, %v3034_v41  ;;  %v4032_v15 = vmul.f32 1.442695, %v1352_v37  ;;  %v1355_v24 = vsub.f32 0.0, %v4021_v14  ;;  %5301 = vst [vmem:[#allocation8_spill] sm:$0xff] %v4035_v31  ;;  %v4037_v13 = vpop.f32.mrb[29].mxu0 }
 0x114   :  { %v3038_v39 = vpop.eup %3037  ;;  %v1663_v55 = vmul.f32 %v3036_v56, %v3735_v19  ;;  %3057 = vrcp.f32 %v1158_v27  ;;  %v4040_v41 = vmul.f32 1.442695, %v971_v59  ;;  %v4044_v58 = vadd.f32 %v3677_v34, %v3854_v16  ;;  %v4046_v19 = vpop.f32.mrb[29].mxu1 }
 0x115   :  { %v3040_v23 = vpop.eup %3039  ;;  %v1277_v28 = vmul.f32 %v3038_v39, %v3741_v29  ;;  %3059 = vrcp.f32 %v1542_v12  ;;  %5302 = vst [vmem:[#allocation9_spill] sm:$0xff] %v4046_v19  ;;  %v4048_v56 = vpop.f32.mrb[30].mxu0  ;;  %v4054_v29 = vadd.f32 %v3682_v35, %v3866_v62 }
 0x116   :  { %5303 = vst [vmem:[#allocation10_spill] sm:$0xff] %v4048_v56  ;;  %v3042_v27 = vpop.eup %3041  ;;  %v2668_v37 = vpack.c.bf16 %v1663_v55, %v1663_v55  ;;  %v1661_v31 = vmul.f32 %v3040_v23, %v3744_v30  ;;  %3061 = vpow2.f32 %v3888_v47  ;;  %v4056_v39 = vpop.f32.mrb[30].mxu1  ;;  %v969_v55 = vsub.f32 0.0, %v4044_v58 }
 0x117   :  { %v4058_v59 = vpop.f32.mrb[31].mxu0  ;;  %v3044_v16 = vpop.eup %3043  ;;  %v2602_v12 = vpack.c.bf16 %v1277_v28, %v1277_v28  ;;  %v1282_v19 = vmul.f32 %v3042_v27, %v3750_v38  ;;  %3063 = vpow2.f32 %v3896_v60  ;;  %v1438_v23 = vmul.f32 1.442695, %v1355_v24 }
 0x118   :  { %v4063_v56 = vpop.f32.mrb[31].mxu1  ;;  %v3046_v30 = vpop.eup %3045  ;;  %2304 = vst.msk [vmem:[%s5291_s6 + $0x1c] sm:$0xf] %vm1976_vm1, %v2668_v37  ;;  %v2666_v62 = vpack.c.bf16 %v1661_v31, %v1661_v31  ;;  %v1666_v47 = vmul.f32 %v3044_v16, %v3754_v48  ;;  %3065 = vpow2.f32 %v3952_v42  ;;  %v1353_v27 = vsub.f32 0.0, %v4054_v29 }
 0x119   :  { %v3048_v28 = vpop.eup %3047  ;;  %1982 = vst.msk [vmem:[%s5290_s5 + $0x14] sm:$0xf] %vm1976_vm1, %v2602_v12  ;;  %v2607_v38 = vpack.c.bf16 %v1282_v19, %v1282_v19  ;;  %v1280_v60 = vmul.f32 %v3046_v30, %v3765_v5  ;;  %3067 = vpow2.f32 %v3958_v10  ;;  %v1050_v24 = vmul.f32 1.442695, %v969_v55  ;;  %v4094_v16 = vpop.f32.mrb[32].mxu0 }
 0x11a   :  { %v3050_v37 = vpop.eup %3049  ;;  %2302 = vst.msk [vmem:[%s5291_s6 + $0x14] sm:$0xf] %vm1976_vm1, %v2666_v62  ;;  %v2671_v48 = vpack.c.bf16 %v1666_v47, %v1666_v47  ;;  %v1664_v42 = vmul.f32 %v3048_v28, %v3770_v11  ;;  %3069 = vpow2.f32 %v3989_v51  ;;  %v4092_v19 = vadd.f32 %v3898_v2, %v3677_v34  ;;  %v4108_v2 = vpop.f32.mrb[33].mxu0 }
 0x11b   :  { %v3052_v31 = vpop.eup %3051  ;;  %1987 = vst.msk [vmem:[%s5290_s5 + $0x28] sm:$0xf] %vm1976_vm1, %v2607_v38  ;;  %v2605_v5 = vpack.c.bf16 %v1280_v60, %v1280_v60  ;;  %v1283_v10 = vmul.f32 %v3050_v37, %v3774_v17  ;;  %3071 = vpow2.f32 %v3995_v32  ;;  %v4104_v17 = vadd.f32 %v3910_v50, %v3682_v35  ;;  %v4106_v32 = vpop.f32.mrb[32].mxu1 }
 0x11c   :  { %v3054_v11 = vpop.eup %3053  ;;  %2307 = vst.msk [vmem:[%s5291_s6 + $0x28] sm:$0xf] %vm1976_vm1, %v2671_v48  ;;  %v2669_v51 = vpack.c.bf16 %v1664_v42, %v1664_v42  ;;  %v1667_v12 = vmul.f32 %v3052_v31, %v3778_v22  ;;  %3073 = vpow2.f32 %v4000_v6  ;;  %v974_v22 = vsub.f32 0.0, %v4092_v19  ;;  %v4117_v6 = vpop.f32.mrb[33].mxu1 }
 0x11d   :  { %v3056_v55 = vpop.eup %3055  ;;  %1985 = vst.msk [vmem:[%s5290_s5 + $0x20] sm:$0xf] %vm1976_vm1, %v2605_v5  ;;  %v2608_v30 = vpack.c.bf16 %v1283_v10, %v1283_v10  ;;  %v1281_v62 = vmul.f32 %v3054_v11, %v3795_v53  ;;  %3075 = vpow2.f32 %v4025_v52  ;;  %v4119_v50 = vpop.f32.mrb[34].mxu0  ;;  %v4127_v53 = vmul.f32 1.442695, %v1353_v27 }
 0x11e   :  { %v3058_v47 = vpop.eup %3057  ;;  %2305 = vst.msk [vmem:[%s5291_s6 + $0x20] sm:$0xf] %vm1976_vm1, %v2669_v51  ;;  %v2672_v28 = vpack.c.bf16 %v1667_v12, %v1667_v12  ;;  %v1665_v38 = vmul.f32 %v3056_v55, %v3804_v63  ;;  %3077 = vpow2.f32 %v4027_v57  ;;  %v4129_v52 = vpop.f32.mrb[34].mxu1  ;;  %v1358_v63 = vsub.f32 0.0, %v4104_v17 }
 0x11f   :  { %v4131_v60 = vpop.f32.mrb[35].mxu0  ;;  %v3060_v37 = vpop.eup %3059  ;;  %1988 = vst.msk [vmem:[%s5290_s5 + $0x2c] sm:$0xf] %vm1976_vm1, %v2608_v30  ;;  %v2606_v48 = vpack.c.bf16 %v1281_v62, %v1281_v62  ;;  %v1286_v42 = vmul.f32 %v3058_v47, %v3810_v7  ;;  %3079 = vpow2.f32 %v4032_v15  ;;  %v4148_v10 = vmul.f32 1.442695, %v974_v22 }
 0x120   :  { %v4140_v57 = vpop.f32.mrb[35].mxu1  ;;  %v3062_v27 = vpop.eup %3061  ;;  %2308 = vst.msk [vmem:[%s5291_s6 + $0x2c] sm:$0xf] %vm1976_vm1, %v2672_v28  ;;  %v2670_v31 = vpack.c.bf16 %v1665_v38, %v1665_v38  ;;  %v1670_v5 = vmul.f32 %v3060_v37, %v3814_v18  ;;  %3081 = vpow2.f32 %v4040_v41  ;;  %v4156_v51 = vadd.f32 %v3677_v34, %v3912_v33 }
 0x121   :  { %v3064_v7 = vpop.eup %3063  ;;  %1986 = vst.msk [vmem:[%s5290_s5 + $0x24] sm:$0xf] %vm1976_vm1, %v2606_v48  ;;  %v2611_v15 = vpack.c.bf16 %v1286_v42, %v1286_v42  ;;  %v1156_v11 = vadd.f32 1.0, %v3062_v27  ;;  %3083 = vpow2.f32 %v1438_v23  ;;  %v4164_v55 = vadd.f32 %v3682_v35, %v3924_v44  ;;  %v4175_v22 = vpop.f32.mrb[36].mxu0 }
 0x122   :  { %v3066_v12 = vpop.eup %3065  ;;  %2306 = vst.msk [vmem:[%s5291_s6 + $0x24] sm:$0xf] %vm1976_vm1, %v2670_v31  ;;  %v2675_v18 = vpack.c.bf16 %v1670_v5, %v1670_v5  ;;  %v1540_v41 = vadd.f32 1.0, %v3064_v7  ;;  %3085 = vpow2.f32 %v1050_v24  ;;  %v972_v23 = vsub.f32 0.0, %v4156_v51  ;;  %v4186_v38 = vpop.f32.mrb[36].mxu1 }
 0x123   :  { %v3068_v30 = vpop.eup %3067  ;;  %1991 = vst.msk [vmem:[%s5290_s5 + $0x38] sm:$0xf] %vm1976_vm1, %v2611_v15  ;;  %3087 = vrcp.f32 %v1156_v11  ;;  %v1159_v33 = vadd.f32 1.0, %v3066_v12  ;;  %v4173_v62 = vadd.f32 %v3926_v61, %v3677_v34  ;;  %v1356_v47 = vsub.f32 0.0, %v4164_v55  ;;  %5304 = vst [vmem:[#allocation11_spill] sm:$0xff] %v4186_v38  ;;  %v4188_v61 = vpop.f32.mrb[37].mxu0 }
 0x124   :  { %v3070_v24 = vpop.eup %3069  ;;  %2311 = vst.msk [vmem:[%s5291_s6 + $0x38] sm:$0xf] %vm1976_vm1, %v2675_v18  ;;  %3089 = vrcp.f32 %v1540_v41  ;;  %v1543_v44 = vadd.f32 1.0, %v3068_v30  ;;  %v4184_v28 = vadd.f32 %v3935_v21, %v3682_v35  ;;  %5305 = vst [vmem:[#allocation12_spill] sm:$0xff] %v4188_v61  ;;  %v4190_v42 = vmul.f32 1.442695, %v1358_v63 }
 0x125   :  { %v3072_v37 = vpop.eup %3071  ;;  %3091 = vrcp.f32 %v1159_v33  ;;  %v1157_v48 = vadd.f32 1.0, %v3070_v24  ;;  %v975_v27 = vsub.f32 0.0, %v4173_v62  ;;  %v4193_v31 = vpop.f32.mrb[37].mxu1  ;;  %v4197_v21 = vmul.f32 1.442695, %v972_v23 }
 0x126   :  { %5306 = vst [vmem:[#allocation13_spill] sm:$0xff] %v4193_v31  ;;  %v4195_v5 = vpop.f32.mrb[38].mxu0  ;;  %v3074_v7 = vpop.eup %3073  ;;  %3093 = vrcp.f32 %v1543_v44  ;;  %v1541_v15 = vadd.f32 1.0, %v3072_v37  ;;  %v4203_v63 = vmul.f32 1.442695, %v1356_v47  ;;  %v4207_v30 = vadd.f32 %v3677_v34, %v3937_v54 }
 0x127   :  { %5307 = vst [vmem:[#allocation14_spill] sm:$0xff] %v4195_v5  ;;  %v4199_v11 = vpop.f32.mrb[38].mxu1  ;;  %v4201_v12 = vpop.f32.mrb[39].mxu0  ;;  %3095 = vrcp.f32 %v1157_v48  ;;  %v1162_v41 = vadd.f32 1.0, %v3074_v7  ;;  %v1359_v23 = vsub.f32 0.0, %v4184_v28  ;;  %v4214_v37 = vadd.f32 %v3682_v35, %v3945_v43 }
 0x128   :  { %5308 = vst [vmem:[#allocation15_spill] sm:$0xff] %v4199_v11  ;;  %5309 = vst [vmem:[#allocation16_spill] sm:$0xff] %v4201_v12  ;;  %v3076_v18 = vpop.eup %3075  ;;  %v4209_v33 = vpop.f32.mrb[39].mxu1  ;;  %3097 = vrcp.f32 %v1541_v15  ;;  %v4216_v47 = vmul.f32 1.442695, %v975_v27  ;;  %v4220_v54 = vadd.f32 %v3981_v0, %v3677_v34  ;;  %v973_v15 = vsub.f32 0.0, %v4207_v30 }
 0x129   :  { %5310 = vst [vmem:[#allocation17_spill] sm:$0xff] %v4209_v33  ;;  %v3078_v24 = vpop.eup %3077  ;;  %v1546_v44 = vadd.f32 1.0, %v3076_v18  ;;  %3099 = vrcp.f32 %v1162_v41  ;;  %v4225_v18 = vadd.f32 %v3985_v36, %v3682_v35  ;;  %v1357_v41 = vsub.f32 0.0, %v4214_v37 }
 0x12a   :  { %v3080_v12 = vpop.eup %3079  ;;  %v1160_v48 = vadd.f32 1.0, %v3078_v24  ;;  %v978_v27 = vsub.f32 0.0, %v4220_v54  ;;  %v4229_v24 = vpop.f32.mrb[40].mxu0 }
 0x12b   :  { %v3082_v7 = vpop.eup %3081  ;;  %3101 = vrcp.f32 %v1546_v44  ;;  %v1544_v33 = vadd.f32 1.0, %v3080_v12  ;;  %5311 = vst [vmem:[#allocation18_spill] sm:$0xff] %v4229_v24  ;;  %v4231_v44 = vmul.f32 1.442695, %v1359_v23  ;;  %v4233_v12 = vpop.f32.mrb[40].mxu1 }
 0x12c   :  { %v3084_v43 = vpop.eup %3083  ;;  %3103 = vrcp.f32 %v1160_v48  ;;  %v1163_v11 = vadd.f32 1.0, %v3082_v7  ;;  %v4235_v31 = vpop.f32.mrb[41].mxu0  ;;  %v1362_v48 = vsub.f32 0.0, %v4225_v18  ;;  %v4240_v7 = vadd.f32 %v3677_v34, %v3987_v25 }
 0x12d   :  { %v3086_v0 = vpop.eup %3085  ;;  %3105 = vrcp.f32 %v1544_v33  ;;  %v1547_v5 = vadd.f32 1.0, %v3084_v43  ;;  %5312 = vst [vmem:[#allocation19_spill] sm:$0xff] %v4235_v31  ;;  %v4242_v38 = vpop.f32.mrb[41].mxu1  ;;  %v4247_v43 = vmul.f32 1.442695, %v973_v15 }
 0x12e   :  { %v3088_v36 = vpop.eup %3087  ;;  %3107 = vrcp.f32 %v1163_v11  ;;  %v1161_v61 = vadd.f32 1.0, %v3086_v0  ;;  %5313 = vst [vmem:[#allocation20_spill] sm:$0xff] %v4242_v38  ;;  %v4244_v24 = vpop.f32.mrb[42].mxu0  ;;  %v4251_v11 = vadd.f32 %v3682_v35, %v3991_v49  ;;  %v4258_v38 = vmul.f32 1.442695, %v1357_v41 }
 0x12f   :  { %5314 = vst [vmem:[#allocation21_spill] sm:$0xff] %v4244_v24  ;;  %v3090_v33 = vpop.eup %3089  ;;  %v1284_v23 = vmul.f32 %v3088_v36, %v3850_v45  ;;  %3109 = vrcp.f32 %v1547_v5  ;;  %v4253_v0 = vpop.f32.mrb[42].mxu1  ;;  %v4260_v24 = vmul.f32 1.442695, %v978_v27  ;;  %v976_v35 = vsub.f32 0.0, %v4240_v7 }
 0x130   :  { %5315 = vst [vmem:[#allocation22_spill] sm:$0xff] %v4253_v0  ;;  %v4255_v31 = vpop.f32.mrb[43].mxu0  ;;  %v3092_v34 = vpop.eup %3091  ;;  %v1668_v25 = vmul.f32 %v3090_v33, %v3864_v46  ;;  %3111 = vrcp.f32 %v1161_v61  ;;  %v4269_v46 = vmul.f32 1.442695, %v1362_v48  ;;  %v4287_v48 = vld [vmem:[%s5288_s3] ss:$0 sm:$0xff] }
 0x131   :  { %5316 = vst [vmem:[#allocation23_spill] sm:$0xff] %v4255_v31  ;;  %v4262_v45 = vpop.f32.mrb[43].mxu1  ;;  %v3094_v5 = vpop.eup %3093  ;;  %v2609_v15 = vpack.c.bf16 %v1284_v23, %v1284_v23  ;;  %v1287_v36 = vmul.f32 %v3092_v34, %v3908_v8  ;;  %3113 = vpow2.f32 %v4127_v53  ;;  %v1360_v53 = vsub.f32 0.0, %v4251_v11 }
 0x132   :  { %v3096_v49 = vpop.eup %3095  ;;  %v2673_v31 = vpack.c.bf16 %v1668_v25, %v1668_v25  ;;  %v1671_v0 = vmul.f32 %v3094_v5, %v3922_v9  ;;  %3115 = vpow2.f32 %v4148_v10  ;;  %v4301_v23 = vpop.f32.mrb[44].mxu1  ;;  %v5319_v25 = vld [vmem:[#allocation2_spill] sm:$0xff] }
 0x133   :  { %v3098_v61 = vpop.eup %3097  ;;  %1989 = vst.msk [vmem:[%s5290_s5 + $0x30] sm:$0xf] %vm1976_vm1, %v2609_v15  ;;  %v2612_v41 = vpack.c.bf16 %v1287_v36, %v1287_v36  ;;  %v1285_v8 = vmul.f32 %v3096_v49, %v3962_v40  ;;  %3117 = vpow2.f32 %v4190_v42  ;;  %v4291_v40 = vadd.f32 %v4287_v48, %v3993_v3  ;;  %v4293_v42 = vpop.f32.mrb[44].mxu0  ;;  %5317 = vst [vmem:[#allocation24_spill] sm:$0xff] %v4301_v23 }
 0x134   :  { %v3100_v27 = vpop.eup %3099  ;;  %2309 = vst.msk [vmem:[%s5291_s6 + $0x30] sm:$0xf] %vm1976_vm1, %v2673_v31  ;;  %v2676_v9 = vpack.c.bf16 %v1671_v0, %v1671_v0  ;;  %v1669_v10 = vmul.f32 %v3098_v61, %v3970_v26  ;;  %3119 = vpow2.f32 %v4197_v21  ;;  %v1064_v21 = vmul.f32 1.442695, %v976_v35  ;;  %v4303_v0 = vpop.f32.mrb[45].mxu0  ;;  %v5323_v61 = vld [vmem:[#allocation4_spill] sm:$0xff] }
 0x135   :  { %v3102_v33 = vpop.eup %3101  ;;  %1992 = vst.msk [vmem:[%s5290_s5 + $0x3c] sm:$0xf] %vm1976_vm1, %v2612_v41  ;;  %v2610_v26 = vpack.c.bf16 %v1285_v8, %v1285_v8  ;;  %v1290_v31 = vmul.f32 %v3100_v27, %v3974_v4  ;;  %3121 = vpow2.f32 %v4203_v63  ;;  %5318 = vst [vmem:[#allocation25_spill] sm:$0xff] %v4303_v0  ;;  %v4314_v4 = vld [vmem:[%s5289_s4] ss:$0 sm:$0xff]  ;;  %v5320_v63 = vld [vmem:[#allocation3_spill] sm:$0xff] }
 0x136   :  { %v3104_v3 = vpop.eup %3103  ;;  %2312 = vst.msk [vmem:[%s5291_s6 + $0x3c] sm:$0xf] %vm1976_vm1, %v2676_v9  ;;  %v2674_v34 = vpack.c.bf16 %v1669_v10, %v1669_v10  ;;  %v1674_v5 = vmul.f32 %v3102_v33, %v5319_v25  ;;  %3123 = vpow2.f32 %v4216_v47  ;;  %v4318_v15 = vadd.f32 %v4314_v4, %v5320_v63  ;;  %v4320_v36 = vpop.f32.mrb[45].mxu1  ;;  %v5328_v63 = vld [vmem:[#allocation7_spill] sm:$0xff] }
 0x137   :  { %5321 = vst [vmem:[#allocation2_spill] sm:$0xff] %v4320_v36  ;;  %v4322_v35 = vpop.f32.mrb[46].mxu0  ;;  %v3106_v49 = vpop.eup %3105  ;;  %1990 = vst.msk [vmem:[%s5290_s5 + $0x34] sm:$0xf] %vm1976_vm1, %v2610_v26  ;;  %v2615_v47 = vpack.c.bf16 %v1290_v31, %v1290_v31  ;;  %v1288_v41 = vmul.f32 %v3104_v3, %v5323_v61  ;;  %3125 = vpow2.f32 %v4231_v44  ;;  %v1448_v8 = vmul.f32 1.442695, %v1360_v53 }
 0x138   :  { %5322 = vst [vmem:[#allocation3_spill] sm:$0xff] %v4322_v35  ;;  %v4330_v27 = vpop.f32.mrb[46].mxu1  ;;  %v4332_v9 = vpop.f32.mrb[47].mxu0  ;;  %2310 = vst.msk [vmem:[%s5291_s6 + $0x34] sm:$0xf] %vm1976_vm1, %v2674_v34  ;;  %v2679_v33 = vpack.c.bf16 %v1674_v5, %v1674_v5  ;;  %v1672_v25 = vmul.f32 %v3106_v49, %v4012_v1  ;;  %3127 = vpow2.f32 %v4247_v43  ;;  %v5326_v26 = vld [vmem:[#allocation5_spill] sm:$0xff]  ;;  %v4464_v0 = vadd.f32 %v4314_v4, %v4063_v56 }
 0x139   :  { %5324 = vst [vmem:[#allocation4_spill] sm:$0xff] %v4330_v27  ;;  %5325 = vst [vmem:[#allocation26_spill] sm:$0xff] %v4332_v9  ;;  %v3108_v10 = vpop.eup %3107  ;;  %v4342_v31 = vadd.f32 %v4287_v48, %v5326_v26  ;;  %v4344_v44 = vpop.f32.mrb[47].mxu1  ;;  %v2613_v3 = vpack.c.bf16 %v1288_v41, %v1288_v41  ;;  %3129 = vpow2.f32 %v4258_v38  ;;  %v979_v1 = vsub.f32 0.0, %v4291_v40 }
 0x13a   :  { %5327 = vst [vmem:[#allocation5_spill] sm:$0xff] %v4344_v44  ;;  %v3110_v53 = vpop.eup %3109  ;;  %1995 = vst.msk [vmem:[%s5290_s5 + $0x48] sm:$0xf] %vm1976_vm1, %v2615_v47  ;;  %v1291_v34 = vmul.f32 %v3108_v10, %v5328_v63  ;;  %v2677_v5 = vpack.c.bf16 %v1672_v25, %v1672_v25  ;;  %3131 = vpow2.f32 %v4260_v24  ;;  %v1363_v47 = vsub.f32 0.0, %v4318_v15  ;;  %v5329_v10 = vld [vmem:[#allocation6_spill] sm:$0xff] }
 0x13b   :  { %v3112_v43 = vpop.eup %3111  ;;  %2315 = vst.msk [vmem:[%s5291_s6 + $0x48] sm:$0xf] %vm1976_vm1, %v2679_v33  ;;  %v1675_v49 = vmul.f32 %v3110_v53, %v4021_v14  ;;  %1993 = vst.msk [vmem:[%s5290_s5 + $0x40] sm:$0xf] %vm1976_vm1, %v2613_v3  ;;  %3133 = vpow2.f32 %v4269_v46  ;;  %v4368_v33 = vadd.f32 %v4314_v4, %v5329_v10  ;;  %v977_v26 = vsub.f32 0.0, %v4342_v31  ;;  %v4375_v53 = vpop.f32.mrb[48].mxu0 }
 0x13c   :  { %v3114_v61 = vpop.eup %3113  ;;  %v2616_v38 = vpack.c.bf16 %v1291_v34, %v1291_v34  ;;  %v1289_v41 = vmul.f32 %v3112_v43, %v4044_v58  ;;  %2313 = vst.msk [vmem:[%s5291_s6 + $0x40] sm:$0xf] %vm1976_vm1, %v2677_v5  ;;  %3135 = vpow2.f32 %v1064_v21  ;;  %5330 = vst [vmem:[#allocation7_spill] sm:$0xff] %v4375_v53  ;;  %v4382_v34 = vpop.f32.mrb[48].mxu1  ;;  %v5340_v44 = vld [vmem:[#allocation10_spill] sm:$0xff] }
 0x13d   :  { %v3116_v14 = vpop.eup %3115  ;;  %v2680_v24 = vpack.c.bf16 %v1675_v49, %v1675_v49  ;;  %v1545_v25 = vadd.f32 1.0, %v3114_v61  ;;  %3137 = vpow2.f32 %v1448_v8  ;;  %v1361_v63 = vsub.f32 0.0, %v4368_v33  ;;  %5331 = vst [vmem:[#allocation6_spill] sm:$0xff] %v4382_v34  ;;  %v4384_v43 = vpop.f32.mrb[49].mxu0  ;;  %v5333_v61 = vld [vmem:[#allocation8_spill] sm:$0xff] }
 0x13e   :  { %v3118_v58 = vpop.eup %3117  ;;  %1996 = vst.msk [vmem:[%s5290_s5 + $0x4c] sm:$0xf] %vm1976_vm1, %v2616_v38  ;;  %v2614_v46 = vpack.c.bf16 %v1289_v41, %v1289_v41  ;;  %v1166_v3 = vadd.f32 1.0, %v3116_v14  ;;  %5332 = vst [vmem:[#allocation27_spill] sm:$0xff] %v4384_v43  ;;  %v4392_v49 = vadd.f32 %v4287_v48, %v4029_v20  ;;  %v4396_v8 = vadd.f32 %v4314_v4, %v5333_v61  ;;  %v4398_v38 = vpop.f32.mrb[49].mxu1 }
 0x13f   :  { %v3120_v21 = vpop.eup %3119  ;;  %2316 = vst.msk [vmem:[%s5291_s6 + $0x4c] sm:$0xf] %vm1976_vm1, %v2680_v24  ;;  %3139 = vrcp.f32 %v1545_v25  ;;  %v1550_v5 = vadd.f32 1.0, %v3118_v58  ;;  %5334 = vst [vmem:[#allocation8_spill] sm:$0xff] %v4398_v38  ;;  %v4400_v41 = vpop.f32.mrb[50].mxu0  ;;  %v4410_v20 = vadd.f32 %v4287_v48, %v4037_v13  ;;  %v5339_v13 = vld [vmem:[#allocation9_spill] sm:$0xff] }
 0x140   :  { %5335 = vst [vmem:[#allocation28_spill] sm:$0xff] %v4400_v41  ;;  %v3122_v10 = vpop.eup %3121  ;;  %1994 = vst.msk [vmem:[%s5290_s5 + $0x44] sm:$0xf] %vm1976_vm1, %v2614_v46  ;;  %3141 = vrcp.f32 %v1166_v3  ;;  %v1164_v14 = vadd.f32 1.0, %v3120_v21  ;;  %v4406_v24 = vmul.f32 1.442695, %v979_v1  ;;  %v4425_v34 = vadd.f32 %v4314_v4, %v5339_v13 }
 0x141   :  { %v4412_v25 = vpop.f32.mrb[50].mxu1  ;;  %v4414_v58 = vpop.f32.mrb[51].mxu0  ;;  %3143 = vrcp.f32 %v1550_v5  ;;  %v1548_v41 = vadd.f32 1.0, %v3122_v10  ;;  %v4416_v38 = vmul.f32 1.442695, %v1363_v47  ;;  %v982_v43 = vsub.f32 0.0, %v4392_v49 }
 0x142   :  { %5336 = vst [vmem:[#allocation29_spill] sm:$0xff] %v4412_v25  ;;  %5337 = vst [vmem:[#allocation30_spill] sm:$0xff] %v4414_v58  ;;  %v3124_v61 = vpop.eup %3123  ;;  %v4419_v46 = vpop.f32.mrb[51].mxu1  ;;  %3145 = vrcp.f32 %v1164_v14  ;;  %v4421_v21 = vmul.f32 1.442695, %v977_v26  ;;  %v1366_v47 = vsub.f32 0.0, %v4396_v8  ;;  %v4435_v13 = vadd.f32 %v4287_v48, %v5340_v44 }
 0x143   :  { %5338 = vst [vmem:[#allocation31_spill] sm:$0xff] %v4419_v46  ;;  %v3126_v3 = vpop.eup %3125  ;;  %v1167_v1 = vadd.f32 1.0, %v3124_v61  ;;  %3147 = vrcp.f32 %v1548_v41  ;;  %v4427_v5 = vmul.f32 1.442695, %v1361_v63  ;;  %v4430_v46 = vmul.f32 1.442695, %v982_v43 }
 0x144   :  { %v3128_v25 = vpop.eup %3127  ;;  %v1551_v58 = vadd.f32 1.0, %v3126_v3  ;;  %v980_v14 = vsub.f32 0.0, %v4410_v20  ;;  %v4439_v63 = vadd.f32 %v4314_v4, %v4056_v39  ;;  %v4441_v41 = vpop.f32.mrb[52].mxu0  ;;  %v1364_v43 = vsub.f32 0.0, %v4425_v34 }
 0x145   :  { %v3130_v10 = vpop.eup %3129  ;;  %3149 = vrcp.f32 %v1167_v1  ;;  %v1165_v53 = vadd.f32 1.0, %v3128_v25  ;;  %5341 = vst [vmem:[#allocation9_spill] sm:$0xff] %v4441_v41  ;;  %v4446_v1 = vadd.f32 %v4287_v48, %v4058_v59  ;;  %v983_v39 = vsub.f32 0.0, %v4435_v13 }
 0x146   :  { %v3132_v26 = vpop.eup %3131  ;;  %3151 = vrcp.f32 %v1551_v58  ;;  %v1549_v61 = vadd.f32 1.0, %v3130_v10  ;;  %v4448_v58 = vpop.f32.mrb[52].mxu1  ;;  %v1367_v41 = vsub.f32 0.0, %v4439_v63  ;;  %v1460_v59 = vmul.f32 1.442695, %v1366_v47 }
 0x147   :  { %v3134_v3 = vpop.eup %3133  ;;  %3153 = vrcp.f32 %v1165_v53  ;;  %v1170_v25 = vadd.f32 1.0, %v3132_v26  ;;  %5342 = vst [vmem:[#allocation10_spill] sm:$0xff] %v4448_v58  ;;  %v4450_v10 = vpop.f32.mrb[53].mxu0  ;;  %v981_v47 = vsub.f32 0.0, %v4446_v1 }
 0x148   :  { %5343 = vst [vmem:[#allocation32_spill] sm:$0xff] %v4450_v10  ;;  %v3136_v44 = vpop.eup %3135  ;;  %3155 = vrcp.f32 %v1549_v61  ;;  %v1554_v9 = vadd.f32 1.0, %v3134_v3  ;;  %v4454_v27 = vpop.f32.mrb[53].mxu1  ;;  %v1072_v3 = vmul.f32 1.442695, %v980_v14 }
 0x149   :  { %5344 = vst [vmem:[#allocation33_spill] sm:$0xff] %v4454_v27  ;;  %v4456_v53 = vpop.f32.mrb[54].mxu0  ;;  %v3138_v26 = vpop.eup %3137  ;;  %3157 = vrcp.f32 %v1170_v25  ;;  %v1168_v35 = vadd.f32 1.0, %v3136_v44  ;;  %v1456_v25 = vmul.f32 1.442695, %v1364_v43 }
 0x14a   :  { %5345 = vst [vmem:[#allocation34_spill] sm:$0xff] %v4456_v53  ;;  %v4458_v36 = vpop.f32.mrb[54].mxu1  ;;  %v4460_v58 = vpop.f32.mrb[55].mxu0  ;;  %3159 = vrcp.f32 %v1554_v9  ;;  %v1552_v61 = vadd.f32 1.0, %v3138_v26  ;;  %v1078_v9 = vmul.f32 1.442695, %v983_v39 }
 0x14b   :  { %5346 = vst [vmem:[#allocation35_spill] sm:$0xff] %v4458_v36  ;;  %5347 = vst [vmem:[#allocation36_spill] sm:$0xff] %v4460_v58  ;;  %v3140_v10 = vpop.eup %3139  ;;  %v4466_v23 = vpop.f32.mrb[55].mxu1  ;;  %3161 = vrcp.f32 %v1168_v35  ;;  %v4471_v26 = vmul.f32 1.442695, %v1367_v41 }
 0x14c   :  { %v3142_v27 = vpop.eup %3141  ;;  %v1673_v53 = vmul.f32 %v3140_v10, %v4054_v29  ;;  %3163 = vrcp.f32 %v1552_v61  ;;  %v4477_v29 = vadd.f32 %v4287_v48, %v4094_v16 }
 0x14d   :  { %v3144_v44 = vpop.eup %3143  ;;  %v1294_v58 = vmul.f32 %v3142_v27, %v4092_v19  ;;  %3165 = vpow2.f32 %v4406_v24  ;;  %v1365_v19 = vsub.f32 0.0, %v4464_v0  ;;  %v4482_v27 = vpop.f32.mrb[56].mxu0  ;;  %v1074_v24 = vmul.f32 1.442695, %v981_v47 }
 0x14e   :  { %v3146_v14 = vpop.eup %3145  ;;  %v2678_v36 = vpack.c.bf16 %v1673_v53, %v1673_v53  ;;  %v1678_v56 = vmul.f32 %v3144_v44, %v4104_v17  ;;  %3167 = vpow2.f32 %v4416_v38 }
 0x14f   :  { %v3148_v35 = vpop.eup %3147  ;;  %v2619_v43 = vpack.c.bf16 %v1294_v58, %v1294_v58  ;;  %v1292_v10 = vmul.f32 %v3146_v14, %v4156_v51  ;;  %3169 = vpow2.f32 %v4421_v21  ;;  %v4490_v58 = vpop.f32.mrb[56].mxu1 }
 0x150   :  { %v3150_v41 = vpop.eup %3149  ;;  %2314 = vst.msk [vmem:[%s5291_s6 + $0x44] sm:$0xf] %vm1976_vm1, %v2678_v36  ;;  %v2683_v17 = vpack.c.bf16 %v1678_v56, %v1678_v56  ;;  %v1676_v16 = vmul.f32 %v3148_v35, %v4164_v55  ;;  %v4492_v51 = vpop.f32.mrb[57].mxu0  ;;  %3171 = vpow2.f32 %v4427_v5  ;;  %v4502_v55 = vadd.f32 %v4314_v4, %v4106_v32 }
 0x151   :  { %v3152_v38 = vpop.eup %3151  ;;  %1999 = vst.msk [vmem:[%s5290_s5 + $0x58] sm:$0xf] %vm1976_vm1, %v2619_v43  ;;  %v2617_v39 = vpack.c.bf16 %v1292_v10, %v1292_v10  ;;  %v1295_v53 = vmul.f32 %v3150_v41, %v4173_v62  ;;  %v4504_v36 = vpop.f32.mrb[57].mxu1  ;;  %3173 = vpow2.f32 %v4430_v46  ;;  %v986_v62 = vsub.f32 0.0, %v4477_v29 }
 0x152   :  { %v4506_v21 = vpop.f32.mrb[58].mxu0  ;;  %v3154_v61 = vpop.eup %3153  ;;  %2319 = vst.msk [vmem:[%s5291_s6 + $0x58] sm:$0xf] %vm1976_vm1, %v2683_v17  ;;  %v2681_v47 = vpack.c.bf16 %v1676_v16, %v1676_v16  ;;  %v1679_v44 = vmul.f32 %v3152_v38, %v4184_v28  ;;  %3175 = vpow2.f32 %v1460_v59  ;;  %v1458_v43 = vmul.f32 1.442695, %v1365_v19 }
 0x153   :  { %v4515_v5 = vpop.f32.mrb[58].mxu1  ;;  %v4517_v32 = vpop.f32.mrb[59].mxu0  ;;  %1997 = vst.msk [vmem:[%s5290_s5 + $0x50] sm:$0xf] %vm1976_vm1, %v2617_v39  ;;  %v2620_v56 = vpack.c.bf16 %v1295_v53, %v1295_v53  ;;  %v1293_v35 = vmul.f32 %v3154_v61, %v4207_v30  ;;  %3177 = vpow2.f32 %v1072_v3  ;;  %v4533_v17 = vadd.f32 %v4287_v48, %v4108_v2 }
 0x154   :  { %v3156_v14 = vpop.eup %3155  ;;  %v4524_v28 = vpop.f32.mrb[59].mxu1  ;;  %2317 = vst.msk [vmem:[%s5291_s6 + $0x50] sm:$0xf] %vm1976_vm1, %v2681_v47  ;;  %v2684_v10 = vpack.c.bf16 %v1679_v44, %v1679_v44  ;;  %3179 = vpow2.f32 %v1456_v25  ;;  %v4542_v19 = vadd.f32 %v4314_v4, %v4117_v6  ;;  %v1084_v38 = vmul.f32 1.442695, %v986_v62 }
 0x155   :  { %v3158_v46 = vpop.eup %3157  ;;  %v1677_v41 = vmul.f32 %v3156_v14, %v4214_v37  ;;  %2000 = vst.msk [vmem:[%s5290_s5 + $0x5c] sm:$0xf] %vm1976_vm1, %v2620_v56  ;;  %v2618_v30 = vpack.c.bf16 %v1293_v35, %v1293_v35  ;;  %3181 = vpow2.f32 %v1078_v9  ;;  %v1370_v25 = vsub.f32 0.0, %v4502_v55  ;;  %v4556_v53 = vpop.f32.mrb[60].mxu0 }
 0x156   :  { %v3160_v16 = vpop.eup %3159  ;;  %v1298_v59 = vmul.f32 %v3158_v46, %v4220_v54  ;;  %2320 = vst.msk [vmem:[%s5291_s6 + $0x5c] sm:$0xf] %vm1976_vm1, %v2684_v10  ;;  %3183 = vpow2.f32 %v4471_v26  ;;  %5348 = vst [vmem:[#allocation37_spill] sm:$0xff] %v4556_v53  ;;  %v984_v47 = vsub.f32 0.0, %v4533_v17  ;;  %v4564_v44 = vpop.f32.mrb[60].mxu1  ;;  %v1368_v56 = vsub.f32 0.0, %v4542_v19 }
 0x157   :  { %v3162_v37 = vpop.eup %3161  ;;  %v2682_v2 = vpack.c.bf16 %v1677_v41, %v1677_v41  ;;  %v1682_v3 = vmul.f32 %v3160_v16, %v4225_v18  ;;  %1998 = vst.msk [vmem:[%s5290_s5 + $0x54] sm:$0xf] %vm1976_vm1, %v2618_v30  ;;  %3185 = vpow2.f32 %v1074_v24  ;;  %5349 = vst [vmem:[#allocation38_spill] sm:$0xff] %v4564_v44  ;;  %v4573_v35 = vpop.f32.mrb[61].mxu1  ;;  %v4583_v41 = vadd.f32 %v4287_v48, %v4119_v50  ;;  %v5359_v44 = vld [vmem:[#allocation14_spill] sm:$0xff] }
 0x158   :  { %v3164_v39 = vpop.eup %3163  ;;  %v2623_v54 = vpack.c.bf16 %v1298_v59, %v1298_v59  ;;  %v1296_v6 = vmul.f32 %v3162_v37, %v4240_v7  ;;  %v4566_v7 = vpop.f32.mrb[61].mxu0  ;;  %3187 = vpow2.f32 %v1458_v43  ;;  %5351 = vst [vmem:[#allocation40_spill] sm:$0xff] %v4573_v35  ;;  %v4595_v37 = vadd.f32 %v4314_v4, %v4129_v52 }
 0x159   :  { %v3166_v61 = vpop.eup %3165  ;;  %2318 = vst.msk [vmem:[%s5291_s6 + $0x54] sm:$0xf] %vm1976_vm1, %v2682_v2  ;;  %v2687_v18 = vpack.c.bf16 %v1682_v3, %v1682_v3  ;;  %v1680_v9 = vmul.f32 %v3164_v39, %v4251_v11  ;;  %5350 = vst [vmem:[#allocation39_spill] sm:$0xff] %v4566_v7  ;;  %v4575_v11 = vpop.f32.mrb[62].mxu0  ;;  %3189 = vpow2.f32 %v1084_v38  ;;  %v1468_v38 = vmul.f32 1.442695, %v1370_v25 }
 0x15a   :  { %v3168_v26 = vpop.eup %3167  ;;  %2003 = vst.msk [vmem:[%s5290_s5 + $0x68] sm:$0xf] %vm1976_vm1, %v2623_v54  ;;  %v2621_v62 = vpack.c.bf16 %v1296_v6, %v1296_v6  ;;  %v1171_v14 = vadd.f32 1.0, %v3166_v61  ;;  %5352 = vst [vmem:[#allocation41_spill] sm:$0xff] %v4575_v11  ;;  %v4585_v43 = vpop.f32.mrb[62].mxu1  ;;  %v4605_v39 = vadd.f32 %v4287_v48, %v4131_v60  ;;  %v4609_v61 = vadd.f32 %v4314_v4, %v4140_v57 }
 0x15b   :  { %v3170_v24 = vpop.eup %3169  ;;  %2323 = vst.msk [vmem:[%s5291_s6 + $0x68] sm:$0xf] %vm1976_vm1, %v2687_v18  ;;  %v2685_v46 = vpack.c.bf16 %v1680_v9, %v1680_v9  ;;  %v1555_v10 = vadd.f32 1.0, %v3168_v26  ;;  %5353 = vst [vmem:[#allocation42_spill] sm:$0xff] %v4585_v43  ;;  %v4587_v16 = vpop.f32.mrb[63].mxu0  ;;  %v1371_v60 = vsub.f32 0.0, %v4595_v37 }
 0x15c   :  { %5354 = vst [vmem:[#allocation43_spill] sm:$0xff] %v4587_v16  ;;  %v3172_v30 = vpop.eup %3171  ;;  %2001 = vst.msk [vmem:[%s5290_s5 + $0x60] sm:$0xf] %vm1976_vm1, %v2621_v62  ;;  %3191 = vrcp.f32 %v1171_v14  ;;  %v1169_v59 = vadd.f32 1.0, %v3170_v24  ;;  %v4597_v2 = vpop.f32.mrb[63].mxu1  ;;  %v987_v62 = vsub.f32 0.0, %v4583_v41  ;;  %v4615_v24 = vadd.f32 %v4287_v48, %v4175_v22 }
 0x15d   :  { %5355 = vst [vmem:[#allocation44_spill] sm:$0xff] %v4597_v2  ;;  %v3174_v50 = vpop.eup %3173  ;;  %2321 = vst.msk [vmem:[%s5291_s6 + $0x60] sm:$0xf] %vm1976_vm1, %v2685_v46  ;;  %3193 = vrcp.f32 %v1555_v10  ;;  %v1553_v3 = vadd.f32 1.0, %v3172_v30  ;;  %v1080_v52 = vmul.f32 1.442695, %v984_v47 }
 0x15e   :  { %v3176_v54 = vpop.eup %3175  ;;  %3195 = vrcp.f32 %v1169_v59  ;;  %v1174_v6 = vadd.f32 1.0, %v3174_v50  ;;  %v1464_v26 = vmul.f32 1.442695, %v1368_v56  ;;  %v985_v57 = vsub.f32 0.0, %v4605_v39  ;;  %v5356_v10 = vld [vmem:[#allocation11_spill] sm:$0xff]  ;;  %v5358_v16 = vld [vmem:[#allocation13_spill] sm:$0xff] }
 0x15f   :  { %v3178_v18 = vpop.eup %3177  ;;  %3197 = vrcp.f32 %v1553_v3  ;;  %v1558_v9 = vadd.f32 1.0, %v3176_v54  ;;  %v4620_v30 = vadd.f32 %v4314_v4, %v5356_v10  ;;  %v1369_v50 = vsub.f32 0.0, %v4609_v61  ;;  %v5357_v3 = vld [vmem:[#allocation12_spill] sm:$0xff] }
 0x160   :  { %v3180_v14 = vpop.eup %3179  ;;  %3199 = vrcp.f32 %v1174_v6  ;;  %v1172_v25 = vadd.f32 1.0, %v3178_v18  ;;  %v4625_v54 = vadd.f32 %v4287_v48, %v5357_v3  ;;  %v1086_v18 = vmul.f32 1.442695, %v987_v62 }
 0x161   :  { %v3182_v47 = vpop.eup %3181  ;;  %3201 = vrcp.f32 %v1558_v9  ;;  %v1556_v46 = vadd.f32 1.0, %v3180_v14  ;;  %v990_v9 = vsub.f32 0.0, %v4615_v24  ;;  %v1374_v10 = vsub.f32 0.0, %v4620_v30 }
 0x162   :  { %v3184_v56 = vpop.eup %3183  ;;  %3203 = vrcp.f32 %v1172_v25  ;;  %v1175_v59 = vadd.f32 1.0, %v3182_v47  ;;  %v4631_v25 = vadd.f32 %v4314_v4, %v5358_v16  ;;  %v1470_v3 = vmul.f32 1.442695, %v1371_v60 }
 0x163   :  { %v3186_v22 = vpop.eup %3185  ;;  %3205 = vrcp.f32 %v1556_v46  ;;  %v1559_v6 = vadd.f32 1.0, %v3184_v56  ;;  %v1082_v11 = vmul.f32 1.442695, %v985_v57  ;;  %v1466_v62 = vmul.f32 1.442695, %v1369_v50 }
 0x164   :  { %v3188_v14 = vpop.eup %3187  ;;  %3207 = vrcp.f32 %v1175_v59  ;;  %v1173_v2 = vadd.f32 1.0, %v3186_v22  ;;  %v988_v56 = vsub.f32 0.0, %v4625_v54  ;;  %v1092_v22 = vmul.f32 1.442695, %v990_v9 }
 0x165   :  { %v3190_v47 = vpop.eup %3189  ;;  %3209 = vrcp.f32 %v1559_v6  ;;  %v1557_v43 = vadd.f32 1.0, %v3188_v14  ;;  %v4637_v16 = vadd.f32 %v4287_v48, %v5359_v44  ;;  %v1476_v60 = vmul.f32 1.442695, %v1374_v10 }
 0x166   :  { %v3192_v35 = vpop.eup %3191  ;;  %3211 = vrcp.f32 %v1173_v2  ;;  %v1178_v46 = vadd.f32 1.0, %v3190_v47  ;;  %v1372_v2 = vsub.f32 0.0, %v4631_v25  ;;  %v5360_v47 = vld [vmem:[#allocation15_spill] sm:$0xff]  ;;  %v1088_v9 = vmul.f32 1.442695, %v988_v56 }
 0x167   :  { %v3194_v7 = vpop.eup %3193  ;;  %v1299_v59 = vmul.f32 %v3192_v35, %v4291_v40  ;;  %3213 = vrcp.f32 %v1557_v43  ;;  %v4644_v40 = vadd.f32 %v4314_v4, %v5360_v47  ;;  %v5362_v47 = vld [vmem:[#allocation17_spill] sm:$0xff] }
 0x168   :  { %v3196_v53 = vpop.eup %3195  ;;  %v1683_v6 = vmul.f32 %v3194_v7, %v4318_v15  ;;  %3215 = vrcp.f32 %v1178_v46  ;;  %v1472_v10 = vmul.f32 1.442695, %v1372_v2 }
 0x169   :  { %v3198_v57 = vpop.eup %3197  ;;  %v2624_v50 = vpack.c.bf16 %v1299_v59, %v1299_v59  ;;  %v1297_v14 = vmul.f32 %v3196_v53, %v4342_v31  ;;  %3217 = vpow2.f32 %v1468_v38  ;;  %v991_v53 = vsub.f32 0.0, %v4637_v16 }
 0x16a   :  { %v3200_v35 = vpop.eup %3199  ;;  %v2688_v43 = vpack.c.bf16 %v1683_v6, %v1683_v6  ;;  %v1681_v44 = vmul.f32 %v3198_v57, %v4368_v33  ;;  %3219 = vpow2.f32 %v1080_v52  ;;  %v1375_v56 = vsub.f32 0.0, %v4644_v40  ;;  %v5361_v6 = vld [vmem:[#allocation16_spill] sm:$0xff] }
 0x16b   :  { %v3202_v15 = vpop.eup %3201  ;;  %2004 = vst.msk [vmem:[%s5290_s5 + $0x6c] sm:$0xf] %vm1976_vm1, %v2624_v50  ;;  %v2622_v7 = vpack.c.bf16 %v1297_v14, %v1297_v14  ;;  %v1302_v31 = vmul.f32 %v3200_v35, %v4392_v49  ;;  %3221 = vpow2.f32 %v1464_v26  ;;  %v4671_v2 = vadd.f32 %v4287_v48, %v5361_v6 }
 0x16c   :  { %v3204_v38 = vpop.eup %3203  ;;  %2324 = vst.msk [vmem:[%s5291_s6 + $0x6c] sm:$0xf] %vm1976_vm1, %v2688_v43  ;;  %v2686_v33 = vpack.c.bf16 %v1681_v44, %v1681_v44  ;;  %v1686_v52 = vmul.f32 %v3202_v15, %v4396_v8  ;;  %3223 = vpow2.f32 %v1086_v18  ;;  %v1094_v50 = vmul.f32 1.442695, %v991_v53 }
 0x16d   :  { %v3206_v46 = vpop.eup %3205  ;;  %2002 = vst.msk [vmem:[%s5290_s5 + $0x64] sm:$0xf] %vm1976_vm1, %v2622_v7  ;;  %v2627_v49 = vpack.c.bf16 %v1302_v31, %v1302_v31  ;;  %v1300_v26 = vmul.f32 %v3204_v38, %v4410_v20  ;;  %3225 = vpow2.f32 %v1470_v3  ;;  %v4685_v35 = vadd.f32 %v4314_v4, %v5362_v47  ;;  %v5363_v7 = vld [vmem:[#allocation18_spill] sm:$0xff] }
 0x16e   :  { %v3208_v59 = vpop.eup %3207  ;;  %2322 = vst.msk [vmem:[%s5291_s6 + $0x64] sm:$0xf] %vm1976_vm1, %v2686_v33  ;;  %v2691_v8 = vpack.c.bf16 %v1686_v52, %v1686_v52  ;;  %v1684_v18 = vmul.f32 %v3206_v46, %v4425_v34  ;;  %3227 = vpow2.f32 %v1082_v11  ;;  %v1478_v44 = vmul.f32 1.442695, %v1375_v56 }
 0x16f   :  { %v3210_v57 = vpop.eup %3209  ;;  %2007 = vst.msk [vmem:[%s5290_s5 + $0x78] sm:$0xf] %vm1976_vm1, %v2627_v49  ;;  %v2625_v20 = vpack.c.bf16 %v1300_v26, %v1300_v26  ;;  %v1303_v3 = vmul.f32 %v3208_v59, %v4435_v13  ;;  %3229 = vpow2.f32 %v1466_v62  ;;  %v4699_v31 = vadd.f32 %v4287_v48, %v5363_v7 }
 0x170   :  { %v3212_v14 = vpop.eup %3211  ;;  %2327 = vst.msk [vmem:[%s5291_s6 + $0x78] sm:$0xf] %vm1976_vm1, %v2691_v8  ;;  %v2689_v34 = vpack.c.bf16 %v1684_v18, %v1684_v18  ;;  %v1687_v11 = vmul.f32 %v3210_v57, %v4439_v63  ;;  %3231 = vpow2.f32 %v1092_v22  ;;  %v989_v38 = vsub.f32 0.0, %v4671_v2  ;;  %v5364_v8 = vld [vmem:[#allocation19_spill] sm:$0xff]  ;;  %v5365_v57 = vld [vmem:[#allocation20_spill] sm:$0xff] }
 0x171   :  { %v3214_v43 = vpop.eup %3213  ;;  %2005 = vst.msk [vmem:[%s5290_s5 + $0x70] sm:$0xf] %vm1976_vm1, %v2625_v20  ;;  %v2628_v13 = vpack.c.bf16 %v1303_v3, %v1303_v3  ;;  %v1301_v62 = vmul.f32 %v3212_v14, %v4446_v1  ;;  %3233 = vpow2.f32 %v1476_v60  ;;  %v1373_v52 = vsub.f32 0.0, %v4685_v35  ;;  %v5366_v3 = vld [vmem:[#allocation21_spill] sm:$0xff] }
 0x172   :  { %v3216_v15 = vpop.eup %3215  ;;  %2325 = vst.msk [vmem:[%s5291_s6 + $0x70] sm:$0xf] %vm1976_vm1, %v2689_v34  ;;  %v2692_v63 = vpack.c.bf16 %v1687_v11, %v1687_v11  ;;  %v1685_v22 = vmul.f32 %v3214_v43, %v4464_v0  ;;  %3235 = vpow2.f32 %v1088_v9  ;;  %v4718_v49 = vadd.f32 %v4314_v4, %v4233_v12 }
 0x173   :  { %v3218_v53 = vpop.eup %3217  ;;  %2008 = vst.msk [vmem:[%s5290_s5 + $0x7c] sm:$0xf] %vm1976_vm1, %v2628_v13  ;;  %v2626_v1 = vpack.c.bf16 %v1301_v62, %v1301_v62  ;;  %v1306_v60 = vmul.f32 %v3216_v15, %v4477_v29  ;;  %3237 = vpow2.f32 %v1472_v10  ;;  %v994_v59 = vsub.f32 0.0, %v4699_v31 }
 0x174   :  { %v3220_v33 = vpop.eup %3219  ;;  %2328 = vst.msk [vmem:[%s5291_s6 + $0x7c] sm:$0xf] %vm1976_vm1, %v2692_v63  ;;  %v2690_v0 = vpack.c.bf16 %v1685_v22, %v1685_v22  ;;  %v1562_v9 = vadd.f32 1.0, %v3218_v53  ;;  %3239 = vpow2.f32 %v1094_v50  ;;  %v4727_v18 = vadd.f32 %v4287_v48, %v5364_v8 }
 0x175   :  { %v3222_v46 = vpop.eup %3221  ;;  %2006 = vst.msk [vmem:[%s5290_s5 + $0x74] sm:$0xf] %vm1976_vm1, %v2626_v1  ;;  %v2631_v29 = vpack.c.bf16 %v1306_v60, %v1306_v60  ;;  %v1176_v10 = vadd.f32 1.0, %v3220_v33  ;;  %3241 = vpow2.f32 %v1478_v44  ;;  %v4735_v20 = vadd.f32 %v4314_v4, %v5365_v57  ;;  %v5367_v44 = vld [vmem:[#allocation22_spill] sm:$0xff] }
 0x176   :  { %v3224_v26 = vpop.eup %3223  ;;  %2326 = vst.msk [vmem:[%s5291_s6 + $0x74] sm:$0xf] %vm1976_vm1, %v2690_v0  ;;  %3243 = vrcp.f32 %v1562_v9  ;;  %v1560_v56 = vadd.f32 1.0, %v3222_v46  ;;  %v4739_v50 = vadd.f32 %v4287_v48, %v5366_v3  ;;  %v1090_v11 = vmul.f32 1.442695, %v989_v38 }
 0x177   :  { %v3226_v6 = vpop.eup %3225  ;;  %2011 = vst.msk [vmem:[%s5290_s5 + $0x88] sm:$0xf] %vm1976_vm1, %v2631_v29  ;;  %3245 = vrcp.f32 %v1176_v10  ;;  %v1179_v12 = vadd.f32 1.0, %v3224_v26  ;;  %v1474_v47 = vmul.f32 1.442695, %v1373_v52  ;;  %v1378_v62 = vsub.f32 0.0, %v4718_v49 }
 0x178   :  { %v3228_v14 = vpop.eup %3227  ;;  %3247 = vrcp.f32 %v1560_v56  ;;  %v1563_v34 = vadd.f32 1.0, %v3226_v6  ;;  %v4744_v15 = vadd.f32 %v4314_v4, %v5367_v44  ;;  %v1100_v7 = vmul.f32 1.442695, %v994_v59  ;;  %v5368_v52 = vld [vmem:[#allocation23_spill] sm:$0xff] }
 0x179   :  { %v3230_v43 = vpop.eup %3229  ;;  %3249 = vrcp.f32 %v1179_v12  ;;  %v1177_v13 = vadd.f32 1.0, %v3228_v14  ;;  %v992_v53 = vsub.f32 0.0, %v4727_v18  ;;  %v1376_v38 = vsub.f32 0.0, %v4735_v20 }
 0x17a   :  { %v3232_v63 = vpop.eup %3231  ;;  %3251 = vrcp.f32 %v1563_v34  ;;  %v1561_v22 = vadd.f32 1.0, %v3230_v43  ;;  %v995_v33 = vsub.f32 0.0, %v4739_v50  ;;  %v4751_v46 = vadd.f32 %v4287_v48, %v5368_v52 }
 0x17b   :  { %v3234_v1 = vpop.eup %3233  ;;  %3253 = vrcp.f32 %v1177_v13  ;;  %v1182_v60 = vadd.f32 1.0, %v3232_v63  ;;  %v4755_v29 = vadd.f32 %v4314_v4, %v4262_v45  ;;  %v1484_v56 = vmul.f32 1.442695, %v1378_v62 }
 0x17c   :  { %v3236_v0 = vpop.eup %3235  ;;  %3255 = vrcp.f32 %v1561_v22  ;;  %v1566_v9 = vadd.f32 1.0, %v3234_v1  ;;  %v1379_v59 = vsub.f32 0.0, %v4744_v15  ;;  %v993_v12 = vsub.f32 0.0, %v4751_v46 }
 0x17d   :  { %v3238_v10 = vpop.eup %3237  ;;  %3257 = vrcp.f32 %v1182_v60  ;;  %v1180_v26 = vadd.f32 1.0, %v3236_v0  ;;  %v4761_v57 = vadd.f32 %v4287_v48, %v4293_v42  ;;  %v1096_v45 = vmul.f32 1.442695, %v992_v53  ;;  %v5369_v60 = vld [vmem:[#allocation24_spill] sm:$0xff] }
 0x17e   :  { %v3240_v8 = vpop.eup %3239  ;;  %3259 = vrcp.f32 %v1566_v9  ;;  %v1564_v6 = vadd.f32 1.0, %v3238_v10  ;;  %v1480_v34 = vmul.f32 1.442695, %v1376_v38  ;;  %v1102_v62 = vmul.f32 1.442695, %v995_v33 }
 0x17f   :  { %v3242_v3 = vpop.eup %3241  ;;  %3261 = vrcp.f32 %v1180_v26  ;;  %v1183_v14 = vadd.f32 1.0, %v3240_v8  ;;  %v1377_v44 = vsub.f32 0.0, %v4755_v29  ;;  %v1486_v1 = vmul.f32 1.442695, %v1379_v59  ;;  %v5370_v26 = vld [vmem:[#allocation25_spill] sm:$0xff] }
 0x180   :  { %v3244_v43 = vpop.eup %3243  ;;  %3263 = vrcp.f32 %v1564_v6  ;;  %v1567_v13 = vadd.f32 1.0, %v3242_v3  ;;  %v4767_v42 = vadd.f32 %v4314_v4, %v5369_v60  ;;  %v1098_v53 = vmul.f32 1.442695, %v993_v12 }
 0x181   :  { %v3246_v63 = vpop.eup %3245  ;;  %v1690_v22 = vmul.f32 %v3244_v43, %v4502_v55  ;;  %3265 = vrcp.f32 %v1183_v14  ;;  %v998_v38 = vsub.f32 0.0, %v4761_v57  ;;  %v4774_v55 = vadd.f32 %v4287_v48, %v5370_v26 }
 0x182   :  { %v3248_v0 = vpop.eup %3247  ;;  %v1304_v9 = vmul.f32 %v3246_v63, %v4533_v17  ;;  %3267 = vrcp.f32 %v1567_v13  ;;  %v1482_v3 = vmul.f32 1.442695, %v1377_v44 }
 0x183   :  { %v3250_v52 = vpop.eup %3249  ;;  %v2695_v33 = vpack.c.bf16 %v1690_v22, %v1690_v22  ;;  %v1688_v10 = vmul.f32 %v3248_v0, %v4542_v19  ;;  %3269 = vpow2.f32 %v1090_v11  ;;  %v1382_v11 = vsub.f32 0.0, %v4767_v42  ;;  %v5371_v22 = vld [vmem:[#allocation2_spill] sm:$0xff] }
 0x184   :  { %v3252_v59 = vpop.eup %3251  ;;  %v2629_v8 = vpack.c.bf16 %v1304_v9, %v1304_v9  ;;  %v1307_v6 = vmul.f32 %v3250_v52, %v4583_v41  ;;  %3271 = vpow2.f32 %v1474_v47  ;;  %v1108_v43 = vmul.f32 1.442695, %v998_v38  ;;  %v5372_v52 = vld [vmem:[#allocation3_spill] sm:$0xff] }
 0x185   :  { %v3254_v17 = vpop.eup %3253  ;;  %2331 = vst.msk [vmem:[%s5291_s6 + $0x88] sm:$0xf] %vm1976_vm1, %v2695_v33  ;;  %v2693_v12 = vpack.c.bf16 %v1688_v10, %v1688_v10  ;;  %v1691_v19 = vmul.f32 %v3252_v59, %v4595_v37  ;;  %3273 = vpow2.f32 %v1100_v7  ;;  %v996_v44 = vsub.f32 0.0, %v4774_v55 }
 0x186   :  { %v3256_v14 = vpop.eup %3255  ;;  %2009 = vst.msk [vmem:[%s5290_s5 + $0x80] sm:$0xf] %vm1976_vm1, %v2629_v8  ;;  %v2632_v41 = vpack.c.bf16 %v1307_v6, %v1307_v6  ;;  %v1305_v47 = vmul.f32 %v3254_v17, %v4605_v39  ;;  %3275 = vpow2.f32 %v1484_v56  ;;  %v4801_v60 = vadd.f32 %v4314_v4, %v5371_v22  ;;  %v5373_v6 = vld [vmem:[#allocation4_spill] sm:$0xff]  ;;  %v5376_v22 = vld [vmem:[#allocation7_spill] sm:$0xff] }
 0x187   :  { %v3258_v13 = vpop.eup %3257  ;;  %2329 = vst.msk [vmem:[%s5291_s6 + $0x80] sm:$0xf] %vm1976_vm1, %v2693_v12  ;;  %v2696_v37 = vpack.c.bf16 %v1691_v19, %v1691_v19  ;;  %v1689_v7 = vmul.f32 %v3256_v14, %v4609_v61  ;;  %3277 = vpow2.f32 %v1096_v45  ;;  %v1492_v9 = vmul.f32 1.442695, %v1382_v11 }
 0x188   :  { %v3260_v63 = vpop.eup %3259  ;;  %2012 = vst.msk [vmem:[%s5290_s5 + $0x8c] sm:$0xf] %vm1976_vm1, %v2632_v41  ;;  %v2630_v39 = vpack.c.bf16 %v1305_v47, %v1305_v47  ;;  %v1310_v56 = vmul.f32 %v3258_v13, %v4615_v24  ;;  %3279 = vpow2.f32 %v1480_v34  ;;  %v4815_v33 = vadd.f32 %v4287_v48, %v5372_v52  ;;  %v4849_v41 = vld [vmem:[%s5288_s3] ss:$0 sm:$0xff] }
 0x189   :  { %v3262_v0 = vpop.eup %3261  ;;  %2332 = vst.msk [vmem:[%s5291_s6 + $0x8c] sm:$0xf] %vm1976_vm1, %v2696_v37  ;;  %v2694_v61 = vpack.c.bf16 %v1689_v7, %v1689_v7  ;;  %v1694_v45 = vmul.f32 %v3260_v63, %v4620_v30  ;;  %3281 = vpow2.f32 %v1102_v62  ;;  %v1104_v26 = vmul.f32 1.442695, %v996_v44  ;;  %v5374_v47 = vld [vmem:[#allocation26_spill] sm:$0xff]  ;;  %v5375_v7 = vld [vmem:[#allocation5_spill] sm:$0xff] }
 0x18a   :  { %v3264_v38 = vpop.eup %3263  ;;  %2010 = vst.msk [vmem:[%s5290_s5 + $0x84] sm:$0xf] %vm1976_vm1, %v2630_v39  ;;  %v2635_v24 = vpack.c.bf16 %v1310_v56, %v1310_v56  ;;  %v1308_v34 = vmul.f32 %v3262_v0, %v4625_v54  ;;  %3283 = vpow2.f32 %v1486_v1  ;;  %v1380_v1 = vsub.f32 0.0, %v4801_v60 }
 0x18b   :  { %v3266_v10 = vpop.eup %3265  ;;  %2330 = vst.msk [vmem:[%s5291_s6 + $0x84] sm:$0xf] %vm1976_vm1, %v2694_v61  ;;  %v2699_v30 = vpack.c.bf16 %v1694_v45, %v1694_v45  ;;  %v1692_v62 = vmul.f32 %v3264_v38, %v4631_v25  ;;  %3285 = vpow2.f32 %v1098_v53  ;;  %v4835_v17 = vadd.f32 %v4314_v4, %v5373_v6  ;;  %v5377_v38 = vld [vmem:[#allocation6_spill] sm:$0xff] }
 0x18c   :  { %v3268_v59 = vpop.eup %3267  ;;  %2015 = vst.msk [vmem:[%s5290_s5 + $0x98] sm:$0xf] %vm1976_vm1, %v2635_v24  ;;  %v2633_v54 = vpack.c.bf16 %v1308_v34, %v1308_v34  ;;  %v1311_v48 = vmul.f32 %v3266_v10, %v4637_v16  ;;  %3287 = vpow2.f32 %v1482_v3  ;;  %v999_v19 = vsub.f32 0.0, %v4815_v33 }
 0x18d   :  { %v3270_v8 = vpop.eup %3269  ;;  %2335 = vst.msk [vmem:[%s5291_s6 + $0x98] sm:$0xf] %vm1976_vm1, %v2699_v30  ;;  %v2697_v25 = vpack.c.bf16 %v1692_v62, %v1692_v62  ;;  %v1695_v53 = vmul.f32 %v3268_v59, %v4644_v40  ;;  %3289 = vpow2.f32 %v1108_v43  ;;  %v4853_v43 = vadd.f32 %v4849_v41, %v5374_v47  ;;  %v5380_v47 = vld [vmem:[#allocation28_spill] sm:$0xff] }
 0x18e   :  { %v3272_v12 = vpop.eup %3271  ;;  %2013 = vst.msk [vmem:[%s5290_s5 + $0x90] sm:$0xf] %vm1976_vm1, %v2633_v54  ;;  %v2636_v16 = vpack.c.bf16 %v1311_v48, %v1311_v48  ;;  %v1181_v3 = vadd.f32 1.0, %v3270_v8  ;;  %3291 = vpow2.f32 %v1492_v9  ;;  %v4861_v44 = vadd.f32 %v4314_v4, %v5375_v7  ;;  %v4875_v4 = vld [vmem:[%s5289_s4] ss:$0 sm:$0xff]  ;;  %v5378_v54 = vld [vmem:[#allocation27_spill] sm:$0xff] }
 0x18f   :  { %v3274_v11 = vpop.eup %3273  ;;  %2333 = vst.msk [vmem:[%s5291_s6 + $0x90] sm:$0xf] %vm1976_vm1, %v2697_v25  ;;  %v2700_v40 = vpack.c.bf16 %v1695_v53, %v1695_v53  ;;  %v1565_v14 = vadd.f32 1.0, %v3272_v12  ;;  %3293 = vpow2.f32 %v1104_v26  ;;  %v1488_v56 = vmul.f32 1.442695, %v1380_v1  ;;  %v5379_v53 = vld [vmem:[#allocation8_spill] sm:$0xff] }
 0x190   :  { %v3276_v13 = vpop.eup %3275  ;;  %2016 = vst.msk [vmem:[%s5290_s5 + $0x9c] sm:$0xf] %vm1976_vm1, %v2636_v16  ;;  %3295 = vrcp.f32 %v1181_v3  ;;  %v1186_v37 = vadd.f32 1.0, %v3274_v11  ;;  %v4869_v0 = vadd.f32 %v4849_v41, %v5376_v22  ;;  %v1383_v9 = vsub.f32 0.0, %v4835_v17 }
 0x191   :  { %v3278_v63 = vpop.eup %3277  ;;  %2336 = vst.msk [vmem:[%s5291_s6 + $0x9c] sm:$0xf] %vm1976_vm1, %v2700_v40  ;;  %3297 = vrcp.f32 %v1565_v14  ;;  %v1570_v39 = vadd.f32 1.0, %v3276_v13  ;;  %v4879_v24 = vadd.f32 %v4875_v4, %v5377_v38  ;;  %v1110_v10 = vmul.f32 1.442695, %v999_v19 }
 0x192   :  { %v3280_v61 = vpop.eup %3279  ;;  %3299 = vrcp.f32 %v1186_v37  ;;  %v1184_v45 = vadd.f32 1.0, %v3278_v63  ;;  %v997_v30 = vsub.f32 0.0, %v4853_v43  ;;  %v1381_v59 = vsub.f32 0.0, %v4861_v44 }
 0x193   :  { %v3282_v34 = vpop.eup %3281  ;;  %3301 = vrcp.f32 %v1570_v39  ;;  %v1568_v52 = vadd.f32 1.0, %v3280_v61  ;;  %v4885_v48 = vadd.f32 %v4849_v41, %v5378_v54  ;;  %v1002_v25 = vsub.f32 0.0, %v4869_v0 }
 0x194   :  { %v3284_v62 = vpop.eup %3283  ;;  %3303 = vrcp.f32 %v1184_v45  ;;  %v1187_v26 = vadd.f32 1.0, %v3282_v34  ;;  %v4890_v6 = vadd.f32 %v4875_v4, %v5379_v53  ;;  %v1494_v3 = vmul.f32 1.442695, %v1383_v9 }
 0x195   :  { %v3286_v1 = vpop.eup %3285  ;;  %3305 = vrcp.f32 %v1568_v52  ;;  %v1571_v8 = vadd.f32 1.0, %v3284_v62  ;;  %v1386_v19 = vsub.f32 0.0, %v4879_v24  ;;  %v1000_v14 = vsub.f32 0.0, %v4885_v48  ;;  %v5381_v62 = vld [vmem:[#allocation29_spill] sm:$0xff] }
 0x196   :  { %v3288_v12 = vpop.eup %3287  ;;  %3307 = vrcp.f32 %v1187_v26  ;;  %v1185_v16 = vadd.f32 1.0, %v3286_v1  ;;  %v4896_v13 = vadd.f32 %v4849_v41, %v5380_v47  ;;  %v1106_v63 = vmul.f32 1.442695, %v997_v30  ;;  %v5383_v47 = vld [vmem:[#allocation31_spill] sm:$0xff] }
 0x197   :  { %v3290_v11 = vpop.eup %3289  ;;  %3309 = vrcp.f32 %v1571_v8  ;;  %v1569_v40 = vadd.f32 1.0, %v3288_v12  ;;  %v1384_v39 = vsub.f32 0.0, %v4890_v6  ;;  %v1490_v45 = vmul.f32 1.442695, %v1381_v59 }
 0x198   :  { %v3292_v37 = vpop.eup %3291  ;;  %3311 = vrcp.f32 %v1185_v16  ;;  %v1190_v7 = vadd.f32 1.0, %v3290_v11  ;;  %v1116_v9 = vmul.f32 1.442695, %v1002_v25  ;;  %v1500_v52 = vmul.f32 1.442695, %v1386_v19  ;;  %v5382_v25 = vld [vmem:[#allocation30_spill] sm:$0xff] }
 0x199   :  { %v3294_v22 = vpop.eup %3293  ;;  %3313 = vrcp.f32 %v1569_v40  ;;  %v1574_v61 = vadd.f32 1.0, %v3292_v37  ;;  %v4901_v26 = vadd.f32 %v4875_v4, %v5381_v62  ;;  %v1112_v30 = vmul.f32 1.442695, %v1000_v14 }
 0x19a   :  { %v3296_v38 = vpop.eup %3295  ;;  %3315 = vrcp.f32 %v1190_v7  ;;  %v1188_v34 = vadd.f32 1.0, %v3294_v22  ;;  %v1003_v8 = vsub.f32 0.0, %v4896_v13  ;;  %v1496_v59 = vmul.f32 1.442695, %v1384_v39 }
 0x19b   :  { %v3298_v54 = vpop.eup %3297  ;;  %v1309_v1 = vmul.f32 %v3296_v38, %v4671_v2  ;;  %3317 = vrcp.f32 %v1574_v61  ;;  %v4908_v16 = vadd.f32 %v4849_v41, %v5382_v25  ;;  %v4913_v2 = vadd.f32 %v4875_v4, %v5383_v47 }
 0x19c   :  { %v3300_v53 = vpop.eup %3299  ;;  %v1693_v12 = vmul.f32 %v3298_v54, %v4685_v35  ;;  %3319 = vrcp.f32 %v1188_v34  ;;  %v1387_v35 = vsub.f32 0.0, %v4901_v26 }
 0x19d   :  { %v3302_v19 = vpop.eup %3301  ;;  %v2634_v11 = vpack.c.bf16 %v1309_v1, %v1309_v1  ;;  %v1314_v40 = vmul.f32 %v3300_v53, %v4699_v31  ;;  %3321 = vpow2.f32 %v1488_v56  ;;  %v1118_v56 = vmul.f32 1.442695, %v1003_v8  ;;  %v5384_v53 = vld [vmem:[#allocation9_spill] sm:$0xff] }
 0x19e   :  { %v3304_v14 = vpop.eup %3303  ;;  %v2698_v37 = vpack.c.bf16 %v1693_v12, %v1693_v12  ;;  %v1698_v7 = vmul.f32 %v3302_v19, %v4718_v49  ;;  %3323 = vpow2.f32 %v1110_v10  ;;  %v1001_v38 = vsub.f32 0.0, %v4908_v16 }
 0x19f   :  { %v3306_v39 = vpop.eup %3305  ;;  %2014 = vst.msk [vmem:[%s5290_s5 + $0x94] sm:$0xf] %vm1976_vm1, %v2634_v11  ;;  %v2639_v22 = vpack.c.bf16 %v1314_v40, %v1314_v40  ;;  %v1312_v31 = vmul.f32 %v3304_v14, %v4727_v18  ;;  %3325 = vpow2.f32 %v1494_v3  ;;  %v1385_v62 = vsub.f32 0.0, %v4913_v2  ;;  %v5385_v14 = vld [vmem:[#allocation10_spill] sm:$0xff] }
 0x1a0   :  { %v3308_v61 = vpop.eup %3307  ;;  %2334 = vst.msk [vmem:[%s5291_s6 + $0x94] sm:$0xf] %vm1976_vm1, %v2698_v37  ;;  %v2703_v49 = vpack.c.bf16 %v1698_v7, %v1698_v7  ;;  %v1696_v10 = vmul.f32 %v3306_v39, %v4735_v20  ;;  %3327 = vpow2.f32 %v1106_v63  ;;  %v1502_v1 = vmul.f32 1.442695, %v1387_v35 }
 0x1a1   :  { %v3310_v34 = vpop.eup %3309  ;;  %2019 = vst.msk [vmem:[%s5290_s5 + $0xa8] sm:$0xf] %vm1976_vm1, %v2639_v22  ;;  %v2637_v18 = vpack.c.bf16 %v1312_v31, %v1312_v31  ;;  %v1315_v3 = vmul.f32 %v3308_v61, %v4739_v50  ;;  %3329 = vpow2.f32 %v1490_v45  ;;  %v4946_v12 = vadd.f32 %v4849_v41, %v5384_v53  ;;  %v5386_v22 = vld [vmem:[#allocation32_spill] sm:$0xff] }
 0x1a2   :  { %v3312_v54 = vpop.eup %3311  ;;  %2339 = vst.msk [vmem:[%s5291_s6 + $0xa8] sm:$0xf] %vm1976_vm1, %v2703_v49  ;;  %v2701_v20 = vpack.c.bf16 %v1696_v10, %v1696_v10  ;;  %v1699_v63 = vmul.f32 %v3310_v34, %v4744_v15  ;;  %3331 = vpow2.f32 %v1116_v9  ;;  %v1114_v19 = vmul.f32 1.442695, %v1001_v38 }
 0x1a3   :  { %v3314_v8 = vpop.eup %3313  ;;  %2017 = vst.msk [vmem:[%s5290_s5 + $0xa0] sm:$0xf] %vm1976_vm1, %v2637_v18  ;;  %v2640_v50 = vpack.c.bf16 %v1315_v3, %v1315_v3  ;;  %v1313_v45 = vmul.f32 %v3312_v54, %v4751_v46  ;;  %3333 = vpow2.f32 %v1500_v52  ;;  %v1498_v40 = vmul.f32 1.442695, %v1385_v62  ;;  %v5387_v18 = vld [vmem:[#allocation33_spill] sm:$0xff] }
 0x1a4   :  { %v3316_v25 = vpop.eup %3315  ;;  %2337 = vst.msk [vmem:[%s5291_s6 + $0xa0] sm:$0xf] %vm1976_vm1, %v2701_v20  ;;  %v2704_v15 = vpack.c.bf16 %v1699_v63, %v1699_v63  ;;  %v1697_v9 = vmul.f32 %v3314_v8, %v4755_v29  ;;  %3335 = vpow2.f32 %v1112_v30  ;;  %v4965_v37 = vadd.f32 %v4875_v4, %v5385_v14  ;;  %v5388_v20 = vld [vmem:[#allocation34_spill] sm:$0xff] }
 0x1a5   :  { %v3318_v11 = vpop.eup %3317  ;;  %2020 = vst.msk [vmem:[%s5290_s5 + $0xac] sm:$0xf] %vm1976_vm1, %v2640_v50  ;;  %v2638_v46 = vpack.c.bf16 %v1313_v45, %v1313_v45  ;;  %v1318_v52 = vmul.f32 %v3316_v25, %v4761_v57  ;;  %3337 = vpow2.f32 %v1496_v59  ;;  %v4978_v31 = vadd.f32 %v4849_v41, %v5386_v22  ;;  %v5390_v25 = vld [vmem:[#allocation36_spill] sm:$0xff] }
 0x1a6   :  { %v3320_v47 = vpop.eup %3319  ;;  %2340 = vst.msk [vmem:[%s5291_s6 + $0xac] sm:$0xf] %vm1976_vm1, %v2704_v15  ;;  %v2702_v29 = vpack.c.bf16 %v1697_v9, %v1697_v9  ;;  %v1702_v30 = vmul.f32 %v3318_v11, %v4767_v42  ;;  %3339 = vpow2.f32 %v1118_v56  ;;  %v1006_v49 = vsub.f32 0.0, %v4946_v12 }
 0x1a7   :  { %v3322_v7 = vpop.eup %3321  ;;  %2018 = vst.msk [vmem:[%s5290_s5 + $0xa4] sm:$0xf] %vm1976_vm1, %v2638_v46  ;;  %v2643_v57 = vpack.c.bf16 %v1318_v52, %v1318_v52  ;;  %v1316_v59 = vmul.f32 %v3320_v47, %v4774_v55  ;;  %3341 = vpow2.f32 %v1502_v1  ;;  %v1390_v34 = vsub.f32 0.0, %v4965_v37  ;;  %v5389_v1 = vld [vmem:[#allocation35_spill] sm:$0xff] }
 0x1a8   :  { %v3324_v35 = vpop.eup %3323  ;;  %2338 = vst.msk [vmem:[%s5291_s6 + $0xa4] sm:$0xf] %vm1976_vm1, %v2702_v29  ;;  %v2707_v42 = vpack.c.bf16 %v1702_v30, %v1702_v30  ;;  %v1572_v39 = vadd.f32 1.0, %v3322_v7  ;;  %3343 = vpow2.f32 %v1114_v19  ;;  %v4992_v3 = vadd.f32 %v4875_v4, %v5387_v18 }
 0x1a9   :  { %v3326_v56 = vpop.eup %3325  ;;  %2023 = vst.msk [vmem:[%s5290_s5 + $0xb8] sm:$0xf] %vm1976_vm1, %v2643_v57  ;;  %v2641_v55 = vpack.c.bf16 %v1316_v59, %v1316_v59  ;;  %v1191_v61 = vadd.f32 1.0, %v3324_v35  ;;  %3345 = vpow2.f32 %v1498_v40  ;;  %v5000_v63 = vadd.f32 %v4849_v41, %v5388_v20 }
 0x1aa   :  { %v3328_v10 = vpop.eup %3327  ;;  %2343 = vst.msk [vmem:[%s5291_s6 + $0xb8] sm:$0xf] %vm1976_vm1, %v2707_v42  ;;  %3347 = vrcp.f32 %v1572_v39  ;;  %v1575_v38 = vadd.f32 1.0, %v3326_v56  ;;  %v5004_v8 = vadd.f32 %v4875_v4, %v5389_v1  ;;  %v1004_v53 = vsub.f32 0.0, %v4978_v31 }
 0x1ab   :  { %v3330_v62 = vpop.eup %3329  ;;  %2021 = vst.msk [vmem:[%s5290_s5 + $0xb0] sm:$0xf] %vm1976_vm1, %v2641_v55  ;;  %3349 = vrcp.f32 %v1191_v61  ;;  %v1189_v54 = vadd.f32 1.0, %v3328_v10  ;;  %v5009_v15 = vadd.f32 %v4849_v41, %v5390_v25  ;;  %v1124_v11 = vmul.f32 1.442695, %v1006_v49 }
 0x1ac   :  { %v3332_v50 = vpop.eup %3331  ;;  %3351 = vrcp.f32 %v1575_v38  ;;  %v1573_v45 = vadd.f32 1.0, %v3330_v62  ;;  %v5013_v46 = vadd.f32 %v4875_v4, %v4466_v23  ;;  %v1508_v47 = vmul.f32 1.442695, %v1390_v34 }
 0x1ad   :  { %v3334_v9 = vpop.eup %3333  ;;  %3353 = vrcp.f32 %v1189_v54  ;;  %v1194_v19 = vadd.f32 1.0, %v3332_v50  ;;  %v1388_v29 = vsub.f32 0.0, %v4992_v3  ;;  %v1007_v7 = vsub.f32 0.0, %v5000_v63 }
 0x1ae   :  { %v3336_v52 = vpop.eup %3335  ;;  %3355 = vrcp.f32 %v1573_v45  ;;  %v1578_v40 = vadd.f32 1.0, %v3334_v9  ;;  %v1391_v57 = vsub.f32 0.0, %v5004_v8  ;;  %v1120_v42 = vmul.f32 1.442695, %v1004_v53 }
 0x1af   :  { %v3338_v30 = vpop.eup %3337  ;;  %3357 = vrcp.f32 %v1194_v19  ;;  %v1192_v14 = vadd.f32 1.0, %v3336_v52  ;;  %v1005_v23 = vsub.f32 0.0, %v5009_v15  ;;  %v1389_v56 = vsub.f32 0.0, %v5013_v46 }
 0x1b0   :  { %v3340_v59 = vpop.eup %3339  ;;  %3359 = vrcp.f32 %v1578_v40  ;;  %v1576_v35 = vadd.f32 1.0, %v3338_v30  ;;  %v5022_v55 = vadd.f32 %v4849_v41, %v4482_v27  ;;  %v1504_v10 = vmul.f32 1.442695, %v1388_v29 }
 0x1b1   :  { %v3342_v39 = vpop.eup %3341  ;;  %3361 = vrcp.f32 %v1192_v14  ;;  %v1195_v22 = vadd.f32 1.0, %v3340_v59  ;;  %v5026_v38 = vadd.f32 %v4875_v4, %v4490_v58  ;;  %v1126_v62 = vmul.f32 1.442695, %v1007_v7 }
 0x1b2   :  { %v3344_v61 = vpop.eup %3343  ;;  %3363 = vrcp.f32 %v1576_v35  ;;  %v1579_v49 = vadd.f32 1.0, %v3342_v39  ;;  %v1510_v54 = vmul.f32 1.442695, %v1391_v57  ;;  %v1122_v50 = vmul.f32 1.442695, %v1005_v23 }
 0x1b3   :  { %v3346_v34 = vpop.eup %3345  ;;  %3365 = vrcp.f32 %v1195_v22  ;;  %v1193_v18 = vadd.f32 1.0, %v3344_v61  ;;  %v5030_v27 = vadd.f32 %v4849_v41, %v4492_v51  ;;  %v1506_v25 = vmul.f32 1.442695, %v1389_v56 }
 0x1b4   :  { %v3348_v20 = vpop.eup %3347  ;;  %3367 = vrcp.f32 %v1579_v49  ;;  %v1577_v1 = vadd.f32 1.0, %v3346_v34  ;;  %v1010_v58 = vsub.f32 0.0, %v5022_v55  ;;  %v1394_v52 = vsub.f32 0.0, %v5026_v38 }
 0x1b5   :  { %v3350_v45 = vpop.eup %3349  ;;  %v1700_v53 = vmul.f32 %v3348_v20, %v4801_v60  ;;  %3369 = vrcp.f32 %v1193_v18  ;;  %v5038_v40 = vadd.f32 %v4875_v4, %v4504_v36  ;;  %v5043_v60 = vadd.f32 %v4849_v41, %v4506_v21 }
 0x1b6   :  { %v3352_v9 = vpop.eup %3351  ;;  %v1319_v19 = vmul.f32 %v3350_v45, %v4815_v33  ;;  %3371 = vrcp.f32 %v1577_v1  ;;  %v1008_v57 = vsub.f32 0.0, %v5030_v27  ;;  %v1516_v61 = vmul.f32 1.442695, %v1394_v52 }
 0x1b7   :  { %v3354_v29 = vpop.eup %3353  ;;  %v2705_v51 = vpack.c.bf16 %v1700_v53, %v1700_v53  ;;  %v1703_v30 = vmul.f32 %v3352_v9, %v4835_v17  ;;  %3373 = vpow2.f32 %v1124_v11  ;;  %v1132_v11 = vmul.f32 1.442695, %v1010_v58 }
 0x1b8   :  { %v3356_v14 = vpop.eup %3355  ;;  %v2644_v7 = vpack.c.bf16 %v1319_v19, %v1319_v19  ;;  %v1317_v33 = vmul.f32 %v3354_v29, %v4853_v43  ;;  %3375 = vpow2.f32 %v1508_v47  ;;  %v1392_v35 = vsub.f32 0.0, %v5038_v40 }
 0x1b9   :  { %v3358_v59 = vpop.eup %3357  ;;  %2341 = vst.msk [vmem:[%s5291_s6 + $0xb0] sm:$0xf] %vm1976_vm1, %v2705_v51  ;;  %v2708_v36 = vpack.c.bf16 %v1703_v30, %v1703_v30  ;;  %v1701_v17 = vmul.f32 %v3356_v14, %v4861_v44  ;;  %3377 = vpow2.f32 %v1120_v42  ;;  %v1011_v39 = vsub.f32 0.0, %v5043_v60 }
 0x1ba   :  { %v3360_v21 = vpop.eup %3359  ;;  %2024 = vst.msk [vmem:[%s5290_s5 + $0xbc] sm:$0xf] %vm1976_vm1, %v2644_v7  ;;  %v2642_v43 = vpack.c.bf16 %v1317_v33, %v1317_v33  ;;  %v1322_v47 = vmul.f32 %v3358_v59, %v4869_v0  ;;  %3379 = vpow2.f32 %v1504_v10  ;;  %v1128_v34 = vmul.f32 1.442695, %v1008_v57 }
 0x1bb   :  { %v3362_v23 = vpop.eup %3361  ;;  %2344 = vst.msk [vmem:[%s5291_s6 + $0xbc] sm:$0xf] %vm1976_vm1, %v2708_v36  ;;  %v2706_v44 = vpack.c.bf16 %v1701_v17, %v1701_v17  ;;  %v1706_v42 = vmul.f32 %v3360_v21, %v4879_v24  ;;  %3381 = vpow2.f32 %v1126_v62  ;;  %v5096_v9 = vadd.f32 %v4875_v4, %v4515_v5  ;;  %v5392_v21 = vld [vmem:[#allocation38_spill] sm:$0xff] }
 0x1bc   :  { %v3364_v22 = vpop.eup %3363  ;;  %2022 = vst.msk [vmem:[%s5290_s5 + $0xb4] sm:$0xf] %vm1976_vm1, %v2642_v43  ;;  %v2647_v0 = vpack.c.bf16 %v1322_v47, %v1322_v47  ;;  %v1320_v56 = vmul.f32 %v3362_v23, %v4885_v48  ;;  %3383 = vpow2.f32 %v1510_v54  ;;  %v1512_v54 = vmul.f32 1.442695, %v1392_v35 }
 0x1bd   :  { %v3366_v49 = vpop.eup %3365  ;;  %2342 = vst.msk [vmem:[%s5291_s6 + $0xb4] sm:$0xf] %vm1976_vm1, %v2706_v44  ;;  %v2711_v24 = vpack.c.bf16 %v1706_v42, %v1706_v42  ;;  %v1704_v10 = vmul.f32 %v3364_v22, %v4890_v6  ;;  %3385 = vpow2.f32 %v1122_v50  ;;  %v1134_v50 = vmul.f32 1.442695, %v1011_v39  ;;  %v5393_v44 = vld [vmem:[#allocation39_spill] sm:$0xff] }
 0x1be   :  { %v3368_v18 = vpop.eup %3367  ;;  %2027 = vst.msk [vmem:[%s5290_s5 + $0xc8] sm:$0xf] %vm1976_vm1, %v2647_v0  ;;  %v2645_v48 = vpack.c.bf16 %v1320_v56, %v1320_v56  ;;  %v1323_v62 = vmul.f32 %v3366_v49, %v4896_v13  ;;  %3387 = vpow2.f32 %v1506_v25  ;;  %v5104_v29 = vadd.f32 %v4849_v41, %v4517_v32  ;;  %v5394_v0 = vld [vmem:[#allocation40_spill] sm:$0xff] }
 0x1bf   :  { %v3370_v20 = vpop.eup %3369  ;;  %2347 = vst.msk [vmem:[%s5291_s6 + $0xc8] sm:$0xf] %vm1976_vm1, %v2711_v24  ;;  %v2709_v6 = vpack.c.bf16 %v1704_v10, %v1704_v10  ;;  %v1707_v1 = vmul.f32 %v3368_v18, %v4901_v26  ;;  %3389 = vpow2.f32 %v1132_v11  ;;  %v5112_v30 = vadd.f32 %v4875_v4, %v4524_v28  ;;  %v5391_v28 = vld [vmem:[#allocation37_spill] sm:$0xff] }
 0x1c0   :  { %v3372_v45 = vpop.eup %3371  ;;  %2025 = vst.msk [vmem:[%s5290_s5 + $0xc0] sm:$0xf] %vm1976_vm1, %v2645_v48  ;;  %v2648_v13 = vpack.c.bf16 %v1323_v62, %v1323_v62  ;;  %v1321_v53 = vmul.f32 %v3370_v20, %v4908_v16  ;;  %3391 = vpow2.f32 %v1516_v61  ;;  %v1395_v57 = vsub.f32 0.0, %v5096_v9 }
 0x1c1   :  { %v3374_v25 = vpop.eup %3373  ;;  %2345 = vst.msk [vmem:[%s5291_s6 + $0xc0] sm:$0xf] %vm1976_vm1, %v2709_v6  ;;  %v2712_v58 = vpack.c.bf16 %v1707_v1, %v1707_v1  ;;  %v1705_v26 = vmul.f32 %v3372_v45, %v4913_v2  ;;  %3393 = vpow2.f32 %v1128_v34  ;;  %v5125_v59 = vadd.f32 %v4849_v41, %v5391_v28  ;;  %v5398_v28 = vld [vmem:[#allocation44_spill] sm:$0xff] }
 0x1c2   :  { %v3376_v19 = vpop.eup %3375  ;;  %2028 = vst.msk [vmem:[%s5290_s5 + $0xcc] sm:$0xf] %vm1976_vm1, %v2648_v13  ;;  %v2646_v16 = vpack.c.bf16 %v1321_v53, %v1321_v53  ;;  %v1198_v52 = vadd.f32 1.0, %v3374_v25  ;;  %3395 = vpow2.f32 %v1512_v54  ;;  %v1009_v11 = vsub.f32 0.0, %v5104_v29  ;;  %v5395_v53 = vld [vmem:[#allocation41_spill] sm:$0xff] }
 0x1c3   :  { %v3378_v51 = vpop.eup %3377  ;;  %2348 = vst.msk [vmem:[%s5291_s6 + $0xcc] sm:$0xf] %vm1976_vm1, %v2712_v58  ;;  %v2710_v5 = vpack.c.bf16 %v1705_v26, %v1705_v26  ;;  %v1582_v2 = vadd.f32 1.0, %v3376_v19  ;;  %3397 = vpow2.f32 %v1134_v50  ;;  %v5130_v43 = vadd.f32 %v4875_v4, %v5392_v21 }
 0x1c4   :  { %v3380_v14 = vpop.eup %3379  ;;  %2026 = vst.msk [vmem:[%s5290_s5 + $0xc4] sm:$0xf] %vm1976_vm1, %v2646_v16  ;;  %3399 = vrcp.f32 %v1198_v52  ;;  %v1196_v32 = vadd.f32 1.0, %v3378_v51  ;;  %v1393_v23 = vsub.f32 0.0, %v5112_v30  ;;  %v5135_v42 = vadd.f32 %v4849_v41, %v5393_v44  ;;  %v5396_v16 = vld [vmem:[#allocation42_spill] sm:$0xff] }
 0x1c5   :  { %v3382_v7 = vpop.eup %3381  ;;  %2346 = vst.msk [vmem:[%s5291_s6 + $0xc4] sm:$0xf] %vm1976_vm1, %v2710_v5  ;;  %3401 = vrcp.f32 %v1582_v2  ;;  %v1580_v33 = vadd.f32 1.0, %v3380_v14  ;;  %v5139_v56 = vadd.f32 %v4875_v4, %v5394_v0  ;;  %v1518_v24 = vmul.f32 1.442695, %v1395_v57  ;;  %v5397_v14 = vld [vmem:[#allocation43_spill] sm:$0xff] }
 0x1c6   :  { %v3384_v36 = vpop.eup %3383  ;;  %3403 = vrcp.f32 %v1196_v32  ;;  %v1199_v17 = vadd.f32 1.0, %v3382_v7  ;;  %v1014_v10 = vsub.f32 0.0, %v5125_v59  ;;  %v1130_v48 = vmul.f32 1.442695, %v1009_v11 }
 0x1c7   :  { %v3386_v47 = vpop.eup %3385  ;;  %3405 = vrcp.f32 %v1580_v33  ;;  %v1583_v35 = vadd.f32 1.0, %v3384_v36  ;;  %v1398_v62 = vsub.f32 0.0, %v5130_v43  ;;  %v1514_v6 = vmul.f32 1.442695, %v1393_v23 }
 0x1c8   :  { %v3388_v39 = vpop.eup %3387  ;;  %3407 = vrcp.f32 %v1199_v17  ;;  %v1197_v22 = vadd.f32 1.0, %v3386_v47  ;;  %v1012_v1 = vsub.f32 0.0, %v5135_v42  ;;  %v1396_v13 = vsub.f32 0.0, %v5139_v56 }
 0x1c9   :  { %v3390_v61 = vpop.eup %3389  ;;  %3409 = vrcp.f32 %v1583_v35  ;;  %v1581_v49 = vadd.f32 1.0, %v3388_v39  ;;  %v5147_v25 = vadd.f32 %v4849_v41, %v5395_v53  ;;  %v1140_v19 = vmul.f32 1.442695, %v1014_v10 }
 0x1ca   :  { %v3392_v34 = vpop.eup %3391  ;;  %3411 = vrcp.f32 %v1197_v22  ;;  %v1202_v18 = vadd.f32 1.0, %v3390_v61  ;;  %v5151_v52 = vadd.f32 %v4875_v4, %v5396_v16  ;;  %v1524_v2 = vmul.f32 1.442695, %v1398_v62 }
 0x1cb   :  { %v3394_v54 = vpop.eup %3393  ;;  %3413 = vrcp.f32 %v1581_v49  ;;  %v1586_v20 = vadd.f32 1.0, %v3392_v34  ;;  %v5155_v32 = vadd.f32 %v4849_v41, %v5397_v14  ;;  %v1136_v57 = vmul.f32 1.442695, %v1012_v1 }
 0x1cc   :  { %v3396_v50 = vpop.eup %3395  ;;  %3415 = vrcp.f32 %v1202_v18  ;;  %v1200_v45 = vadd.f32 1.0, %v3394_v54  ;;  %v5160_v36 = vadd.f32 %v4875_v4, %v5398_v28  ;;  %v1520_v21 = vmul.f32 1.442695, %v1396_v13 }
 0x1cd   :  { %v3398_v58 = vpop.eup %3397  ;;  %3417 = vrcp.f32 %v1586_v20  ;;  %v1584_v26 = vadd.f32 1.0, %v3396_v50  ;;  %v1015_v47 = vsub.f32 0.0, %v5147_v25  ;;  %v1013_v4 = vsub.f32 0.0, %v5155_v32 }
 0x1ce   :  { %v3400_v51 = vpop.eup %3399  ;;  %3419 = vrcp.f32 %v1200_v45  ;;  %v1203_v5 = vadd.f32 1.0, %v3398_v58 }
 0x1cf   :  { %v3402_v7 = vpop.eup %3401  ;;  %v1326_v33 = vmul.f32 %v3400_v51, %v4946_v12  ;;  %3421 = vrcp.f32 %v1584_v26  ;;  %v1399_v12 = vsub.f32 0.0, %v5151_v52  ;;  %v1142_v10 = vmul.f32 1.442695, %v1015_v47 }
 0x1d0   :  { %v3404_v17 = vpop.eup %3403  ;;  %v1710_v11 = vmul.f32 %v3402_v7, %v4965_v37  ;;  %3423 = vrcp.f32 %v1203_v5  ;;  %v1138_v20 = vmul.f32 1.442695, %v1013_v4 }
 0x1d1   :  { %v3406_v35 = vpop.eup %3405  ;;  %v2651_v23 = vpack.c.bf16 %v1326_v33, %v1326_v33  ;;  %v1324_v41 = vmul.f32 %v3404_v17, %v4978_v31  ;;  %3425 = vpow2.f32 %v1518_v24  ;;  %v1397_v31 = vsub.f32 0.0, %v5160_v36 }
 0x1d2   :  { %v3408_v44 = vpop.eup %3407  ;;  %v2715_v39 = vpack.c.bf16 %v1710_v11, %v1710_v11  ;;  %v1708_v22 = vmul.f32 %v3406_v35, %v4992_v3  ;;  %3427 = vpow2.f32 %v1130_v48  ;;  %v1526_v48 = vmul.f32 1.442695, %v1399_v12 }
 0x1d3   :  { %v3410_v0 = vpop.eup %3409  ;;  %2031 = vst.msk [vmem:[%s5290_s5 + $0xd8] sm:$0xf] %vm1976_vm1, %v2651_v23  ;;  %v2649_v37 = vpack.c.bf16 %v1324_v41, %v1324_v41  ;;  %v1327_v61 = vmul.f32 %v3408_v44, %v5000_v63  ;;  %3429 = vpow2.f32 %v1514_v6  ;;  %v1522_v50 = vmul.f32 1.442695, %v1397_v31 }
 0x1d4   :  { %v3412_v49 = vpop.eup %3411  ;;  %2351 = vst.msk [vmem:[%s5291_s6 + $0xd8] sm:$0xf] %vm1976_vm1, %v2715_v39  ;;  %v2713_v3 = vpack.c.bf16 %v1708_v22, %v1708_v22  ;;  %v1711_v24 = vmul.f32 %v3410_v0, %v5004_v8  ;;  %3431 = vpow2.f32 %v1140_v19 }
 0x1d5   :  { %v3414_v34 = vpop.eup %3413  ;;  %2029 = vst.msk [vmem:[%s5290_s5 + $0xd0] sm:$0xf] %vm1976_vm1, %v2649_v37  ;;  %v2652_v63 = vpack.c.bf16 %v1327_v61, %v1327_v61  ;;  %v1325_v18 = vmul.f32 %v3412_v49, %v5009_v15  ;;  %3433 = vpow2.f32 %v1524_v2 }
 0x1d6   :  { %v3416_v62 = vpop.eup %3415  ;;  %2349 = vst.msk [vmem:[%s5291_s6 + $0xd0] sm:$0xf] %vm1976_vm1, %v2713_v3  ;;  %v2716_v8 = vpack.c.bf16 %v1711_v24, %v1711_v24  ;;  %v1709_v54 = vmul.f32 %v3414_v34, %v5013_v46  ;;  %3435 = vpow2.f32 %v1136_v57 }
 0x1d7   :  { %v3418_v6 = vpop.eup %3417  ;;  %2032 = vst.msk [vmem:[%s5290_s5 + $0xdc] sm:$0xf] %vm1976_vm1, %v2652_v63  ;;  %v2650_v15 = vpack.c.bf16 %v1325_v18, %v1325_v18  ;;  %v1330_v1 = vmul.f32 %v3416_v62, %v5022_v55  ;;  %3437 = vpow2.f32 %v1520_v21 }
 0x1d8   :  { %v3420_v45 = vpop.eup %3419  ;;  %2352 = vst.msk [vmem:[%s5291_s6 + $0xdc] sm:$0xf] %vm1976_vm1, %v2716_v8  ;;  %v2714_v46 = vpack.c.bf16 %v1709_v54, %v1709_v54  ;;  %v1714_v13 = vmul.f32 %v3418_v6, %v5026_v38  ;;  %3439 = vpow2.f32 %v1142_v10 }
 0x1d9   :  { %v3422_v53 = vpop.eup %3421  ;;  %2030 = vst.msk [vmem:[%s5290_s5 + $0xd4] sm:$0xf] %vm1976_vm1, %v2650_v15  ;;  %v2655_v58 = vpack.c.bf16 %v1330_v1, %v1330_v1  ;;  %v1328_v55 = vmul.f32 %v3420_v45, %v5030_v27  ;;  %3441 = vpow2.f32 %v1526_v48 }
 0x1da   :  { %v3424_v26 = vpop.eup %3423  ;;  %2350 = vst.msk [vmem:[%s5291_s6 + $0xd4] sm:$0xf] %vm1976_vm1, %v2714_v46  ;;  %v2719_v19 = vpack.c.bf16 %v1714_v13, %v1714_v13  ;;  %v1712_v38 = vmul.f32 %v3422_v53, %v5038_v40  ;;  %3443 = vpow2.f32 %v1138_v20 }
 0x1db   :  { %v3426_v16 = vpop.eup %3425  ;;  %2035 = vst.msk [vmem:[%s5290_s5 + $0xe8] sm:$0xf] %vm1976_vm1, %v2655_v58  ;;  %v2653_v51 = vpack.c.bf16 %v1328_v55, %v1328_v55  ;;  %v1331_v27 = vmul.f32 %v3424_v26, %v5043_v60  ;;  %3445 = vpow2.f32 %v1522_v50 }
 0x1dc   :  { %v3428_v5 = vpop.eup %3427  ;;  %2355 = vst.msk [vmem:[%s5291_s6 + $0xe8] sm:$0xf] %vm1976_vm1, %v2719_v19  ;;  %v2717_v2 = vpack.c.bf16 %v1712_v38, %v1712_v38  ;;  %v1587_v14 = vadd.f32 1.0, %v3426_v16 }
 0x1dd   :  { %v3430_v40 = vpop.eup %3429  ;;  %2033 = vst.msk [vmem:[%s5290_s5 + $0xe0] sm:$0xf] %vm1976_vm1, %v2653_v51  ;;  %v2656_v7 = vpack.c.bf16 %v1331_v27, %v1331_v27  ;;  %v1201_v33 = vadd.f32 1.0, %v3428_v5 }
 0x1de   :  { %v3432_v57 = vpop.eup %3431  ;;  %2353 = vst.msk [vmem:[%s5291_s6 + $0xe0] sm:$0xf] %vm1976_vm1, %v2717_v2  ;;  %3447 = vrcp.f32 %v1587_v14  ;;  %v1585_v60 = vadd.f32 1.0, %v3430_v40 }
 0x1df   :  { %v3434_v28 = vpop.eup %3433  ;;  %2036 = vst.msk [vmem:[%s5290_s5 + $0xec] sm:$0xf] %vm1976_vm1, %v2656_v7  ;;  %3449 = vrcp.f32 %v1201_v33  ;;  %v1206_v17 = vadd.f32 1.0, %v3432_v57 }
 0x1e0   :  { %v3436_v11 = vpop.eup %3435  ;;  %3451 = vrcp.f32 %v1585_v60  ;;  %v1590_v21 = vadd.f32 1.0, %v3434_v28 }
 0x1e1   :  { %v3438_v47 = vpop.eup %3437  ;;  %3453 = vrcp.f32 %v1206_v17  ;;  %v1204_v35 = vadd.f32 1.0, %v3436_v11 }
 0x1e2   :  { %v3440_v23 = vpop.eup %3439  ;;  %3455 = vrcp.f32 %v1590_v21  ;;  %v1588_v41 = vadd.f32 1.0, %v3438_v47 }
 0x1e3   :  { %v3442_v12 = vpop.eup %3441  ;;  %3457 = vrcp.f32 %v1204_v35  ;;  %v1207_v44 = vadd.f32 1.0, %v3440_v23 }
 0x1e4   :  { %v3444_v39 = vpop.eup %3443  ;;  %3459 = vrcp.f32 %v1588_v41  ;;  %v1591_v22 = vadd.f32 1.0, %v3442_v12 }
 0x1e5   :  { %v3446_v4 = vpop.eup %3445  ;;  %3461 = vrcp.f32 %v1207_v44  ;;  %v1205_v0 = vadd.f32 1.0, %v3444_v39 }
 0x1e6   :  { %3463 = vrcp.f32 %v1591_v22  ;;  %v1589_v37 = vadd.f32 1.0, %v3446_v4 }
 0x1e7   :  { %3465 = vrcp.f32 %v1205_v0 }
 0x1e8   :  { %v3448_v61 = vpop.eup %3447  ;;  %3467 = vrcp.f32 %v1589_v37 }
 0x1e9   :  { %v3450_v31 = vpop.eup %3449  ;;  %v1715_v49 = vmul.f32 %v3448_v61, %v5096_v9 }
 0x1ea   :  { %v3452_v3 = vpop.eup %3451  ;;  %v1329_v24 = vmul.f32 %v3450_v31, %v5104_v29 }
 0x1eb   :  { %v3454_v10 = vpop.eup %3453  ;;  %v2720_v34 = vpack.c.bf16 %v1715_v49, %v1715_v49  ;;  %v1713_v63 = vmul.f32 %v3452_v3, %v5112_v30 }
 0x1ec   :  { %v3456_v18 = vpop.eup %3455  ;;  %v2654_v48 = vpack.c.bf16 %v1329_v24, %v1329_v24  ;;  %v1334_v62 = vmul.f32 %v3454_v10, %v5125_v59 }
 0x1ed   :  { %v3458_v8 = vpop.eup %3457  ;;  %2356 = vst.msk [vmem:[%s5291_s6 + $0xec] sm:$0xf] %vm1976_vm1, %v2720_v34  ;;  %v2718_v54 = vpack.c.bf16 %v1713_v63, %v1713_v63  ;;  %v1718_v9 = vmul.f32 %v3456_v18, %v5130_v43 }
 0x1ee   :  { %v3460_v20 = vpop.eup %3459  ;;  %2034 = vst.msk [vmem:[%s5290_s5 + $0xe4] sm:$0xf] %vm1976_vm1, %v2654_v48  ;;  %v2659_v29 = vpack.c.bf16 %v1334_v62, %v1334_v62  ;;  %v1332_v30 = vmul.f32 %v3458_v8, %v5135_v42 }
 0x1ef   :  { %v3462_v6 = vpop.eup %3461  ;;  %2354 = vst.msk [vmem:[%s5291_s6 + $0xe4] sm:$0xf] %vm1976_vm1, %v2718_v54  ;;  %v2723_v59 = vpack.c.bf16 %v1718_v9, %v1718_v9  ;;  %v1716_v15 = vmul.f32 %v3460_v20, %v5139_v56 }
 0x1f0   :  { %v3464_v1 = vpop.eup %3463  ;;  %2039 = vst.msk [vmem:[%s5290_s5 + $0xf8] sm:$0xf] %vm1976_vm1, %v2659_v29  ;;  %v2657_v43 = vpack.c.bf16 %v1332_v30, %v1332_v30  ;;  %v1335_v50 = vmul.f32 %v3462_v6, %v5147_v25 }
 0x1f1   :  { %v3466_v45 = vpop.eup %3465  ;;  %2359 = vst.msk [vmem:[%s5291_s6 + $0xf8] sm:$0xf] %vm1976_vm1, %v2723_v59  ;;  %v2721_v42 = vpack.c.bf16 %v1716_v15, %v1716_v15  ;;  %v1719_v46 = vmul.f32 %v3464_v1, %v5151_v52 }
 0x1f2   :  { %v3468_v13 = vpop.eup %3467  ;;  %2037 = vst.msk [vmem:[%s5290_s5 + $0xf0] sm:$0xf] %vm1976_vm1, %v2657_v43  ;;  %v2660_v56 = vpack.c.bf16 %v1335_v50, %v1335_v50  ;;  %v1333_v53 = vmul.f32 %v3466_v45, %v5155_v32 }
 0x1f3   :  { %2357 = vst.msk [vmem:[%s5291_s6 + $0xf0] sm:$0xf] %vm1976_vm1, %v2721_v42  ;;  %v2724_v25 = vpack.c.bf16 %v1719_v46, %v1719_v46  ;;  %v1717_v58 = vmul.f32 %v3468_v13, %v5160_v36 }
 0x1f4   :  { %2040 = vst.msk [vmem:[%s5290_s5 + $0xfc] sm:$0xf] %vm1976_vm1, %v2660_v56  ;;  %v2658_v52 = vpack.c.bf16 %v1333_v53, %v1333_v53 }
 0x1f5   :  { %2360 = vst.msk [vmem:[%s5291_s6 + $0xfc] sm:$0xf] %vm1976_vm1, %v2724_v25  ;;  %v2722_v32 = vpack.c.bf16 %v1717_v58, %v1717_v58 }
 0x1f6   :  { %2038 = vst.msk [vmem:[%s5290_s5 + $0xf4] sm:$0xf] %vm1976_vm1, %v2658_v52 }
 0x1f7   :  { %2358 = vst.msk [vmem:[%s5291_s6 + $0xf4] sm:$0xf] %vm1976_vm1, %v2722_v32 }

</bundles_post_ra>
